<compile_context>
chip_gen: v6e
topology: v6e:2x2x1
jax: 0.10.0
libtpu: 0.0.40
codegen_flags: <defaults>
</compile_context>

<pallas_src>
import functools
import math

import jax
import jax.numpy as jnp
import numpy as np
from jax.experimental import pallas as pl
from jax.experimental.pallas import tpu as pltpu


# ----------------------------------------------------------------------------
# Interpolation coefficients (PyTorch trilinear, align_corners=False)
# ----------------------------------------------------------------------------
def _linear_coeffs(in_size, out_size, scale):
    """Per output index: (i0, i1, w0, w1) with out = w0*x[i0] + w1*x[i1]."""
    coefs = []
    for o in range(out_size):
        if in_size == out_size:
            coefs.append((o, o, 1.0, 0.0))
            continue
        src = (o + 0.5) / scale - 0.5          # PyTorch uses ratio = 1/scale_factor
        src = max(src, 0.0)                     # clamp (align_corners=False)
        i0 = min(int(math.floor(src)), in_size - 1)
        i1 = min(i0 + 1, in_size - 1)
        lam = src - i0
        coefs.append((i0, i1, 1.0 - lam, lam))
    return coefs


def _interp_matrix_np(in_size, out_size, scale):
    m = np.zeros((out_size, in_size), dtype=np.float32)
    for o, (i0, i1, w0, w1) in enumerate(_linear_coeffs(in_size, out_size, scale)):
        m[o, i0] += w0
        m[o, i1] += w1
    return m


def _norm_scale(scale_factor):
    if isinstance(scale_factor, (tuple, list)):
        sd, sh, sw = (float(s) for s in scale_factor)
    else:
        sd = sh = sw = float(scale_factor)
    return sd, sh, sw


# ----------------------------------------------------------------------------
# Fused kernel: conv1x1x1 + trilinear upsample as two MXU matmuls
# ----------------------------------------------------------------------------
def _dsv_fused_kernel(x_ref, mad_ref, ahw_ref, b_ref, o_ref, t_ref):
    # x_ref:   (1, Cin*D, H*W)      input volume for batch n
    # mad_ref: (Cout*Do, Cin*D)     kron(conv_weight, AD)  (channel + depth map)
    # ahw_ref: (H*W, Tcol)          column tile of kron(AH, AW)^T  (H/W map)
    # b_ref:   (Cout*Do, 1)         conv bias, repeated Do times per channel
    # o_ref:   (1, Cout*Do, Tcol)   lane-dense output tile
    # t_ref:   VMEM scratch (Cout*Do, H*W), cached across column tiles of one n
    @pl.when(pl.program_id(1) == 0)
    def _():
        t_ref[...] = (
            jnp.dot(mad_ref[...], x_ref[0], preferred_element_type=jnp.float32)
            + b_ref[...]
        )

    o_ref[0] = jnp.dot(
        t_ref[...], ahw_ref[...], preferred_element_type=jnp.float32
    ).astype(o_ref.dtype)


# ----------------------------------------------------------------------------
# VMEM budgeting / lane-axis tiling of the output
# ----------------------------------------------------------------------------
def _vmem_estimate(cin_d, hw, cdo, tcol):
    b = 4  # f32
    x_bytes = 2 * cin_d * hw * b          # double-buffered input block
    mad_bytes = 2 * cdo * cin_d * b       # constant block (double-buffered alloc)
    ahw_bytes = 2 * hw * tcol * b         # double-buffered AHWT column tile
    bias_bytes = 2 * cdo * 128 * b        # (Cout*Do, 1) padded to 128 lanes
    out_bytes = 2 * cdo * tcol * b        # double-buffered output tile
    t_bytes = cdo * hw * b                # scratch
    return x_bytes + mad_bytes + ahw_bytes + bias_bytes + out_bytes + t_bytes


def _pick_col_tile(ho_wo, cin_d, hw, cdo, budget=12 << 20):
    """Pick a lane-axis (Ho*Wo) tile: multiple of 128 dividing Ho*Wo, VMEM-bounded."""
    if ho_wo % 128 != 0 or _vmem_estimate(cin_d, hw, cdo, ho_wo) <= budget:
        # Full extent is always a legal block shape (and the only legal one if
        # Ho*Wo is not a multiple of 128).
        return ho_wo
    per_col = 2 * (hw + cdo) * 4
    fixed = _vmem_estimate(cin_d, hw, cdo, 0)
    avail = max(budget - fixed, 128 * per_col)
    cap = max(128, min(ho_wo, avail // per_col) // 128 * 128)
    for t in range(cap, 127, -128):
        if ho_wo % t == 0:
            return t
    # TODO(synk): remainder-masked last column tile for awkward Ho*Wo values.
    return ho_wo


# ----------------------------------------------------------------------------
# Forward
# ----------------------------------------------------------------------------
def deep_supervision_forward(x, weight, bias, scale_factor):
    # x: (N, Cin, D, H, W) NCDHW (PyTorch layout)
    # weight: (Cout, Cin)  == PyTorch Conv3d weight (Cout, Cin, 1, 1, 1) squeezed
    # bias:   (Cout,)
    if weight.ndim == 5:
        weight = weight.reshape(weight.shape[0], weight.shape[1])
    N, Cin, D, H, W = x.shape
    Cout = weight.shape[0]
    sd, sh, sw = _norm_scale(scale_factor)
    Do = int(math.floor(D * sd))
    Ho = int(math.floor(H * sh))
    Wo = int(math.floor(W * sw))

    HW = H * W
    HoWo = Ho * Wo
    CinD = Cin * D
    CDo = Cout * Do

    # ---- trace-time constant matrices ---------------------------------------
    ad = _interp_matrix_np(D, Do, sd)                       # (Do, D)
    ah = _interp_matrix_np(H, Ho, sh)                       # (Ho, H)
    aw = _interp_matrix_np(W, Wo, sw)                       # (Wo, W)
    # TODO(synk): for very large H*W (kron matrix over ~tens of MiB) switch to a
    # separable / sparse H-W upsample path instead of the dense Kronecker matrix.
    ahw_t = jnp.asarray(np.kron(ah, aw).T)                  # (H*W, Ho*Wo)
    # kron(W, AD): row (c*Do + a), col (ci*D + d) = W[c,ci] * AD[a,d]
    mad = jnp.kron(weight.astype(jnp.float32), jnp.asarray(ad))   # (Cout*Do, Cin*D)
    bias_col = jnp.repeat(bias.astype(jnp.float32), Do).reshape(CDo, 1)

    # ---- free metadata reshapes ---------------------------------------------
    x3 = x.astype(jnp.float32).reshape(N, CinD, HW)

    # ---- tiling / VMEM ------------------------------------------------------
    Tcol = _pick_col_tile(HoWo, CinD, HW, CDo)
    n_col = HoWo // Tcol if HoWo % Tcol == 0 else 1
    if n_col == 1:
        Tcol = HoWo
    vmem_est = _vmem_estimate(CinD, HW, CDo, Tcol)
    cp_kwargs = dict(dimension_semantics=("parallel", "arbitrary"))
    if vmem_est > (14 << 20):
        # Explicit limit (with headroom) when the default scoped VMEM would be
        # exceeded; capped below v7x's 64 MiB physical VMEM.
        cp_kwargs["vmem_limit_bytes"] = min(int(vmem_est * 1.25) + (2 << 20), 56 << 20)

    out = pl.pallas_call(
        _dsv_fused_kernel,
        out_shape=jax.ShapeDtypeStruct((N, CDo, HoWo), jnp.float32),
        grid=(N, n_col),
        in_specs=[
            pl.BlockSpec((1, CinD, HW), lambda n, c: (n, 0, 0)),
            pl.BlockSpec((CDo, CinD), lambda n, c: (0, 0)),
            pl.BlockSpec((HW, Tcol), lambda n, c: (0, c)),
            pl.BlockSpec((CDo, 1), lambda n, c: (0, 0)),
        ],
        out_specs=pl.BlockSpec((1, CDo, Tcol), lambda n, c: (n, 0, c)),
        scratch_shapes=[pltpu.VMEM((CDo, HW), jnp.float32)],
        compiler_params=pltpu.CompilerParams(**cp_kwargs),
    )(x3, mad, ahw_t, bias_col)

    # free row-major metadata reshape back to NCDHW
    return out.reshape(N, Cout, Do, Ho, Wo)


# ----------------------------------------------------------------------------
# Pure-JAX reference (independent path, for correctness check)
# ----------------------------------------------------------------------------
def _axis_linear_resize_ref(y, axis, in_size, out_size, scale):
    if in_size == out_size:
        return y
    o = jnp.arange(out_size, dtype=jnp.float32)
    src = jnp.maximum((o + 0.5) / scale - 0.5, 0.0)
    i0 = jnp.minimum(jnp.floor(src), in_size - 1).astype(jnp.int32)
    i1 = jnp.minimum(i0 + 1, in_size - 1)
    lam = src - i0.astype(jnp.float32)
    shape = [1] * y.ndim
    shape[axis] = out_size
    lam = lam.reshape(shape)
    return (1.0 - lam) * jnp.take(y, i0, axis=axis) + lam * jnp.take(y, i1, axis=axis)


def dsv_reference(x, weight, bias, scale_factor):
    sd, sh, sw = _norm_scale(scale_factor)
    N, Cin, D, H, W = x.shape
    y = jnp.einsum("ncdhw,oc->nodhw", x, weight) + bias[None, :, None, None, None]
    Do = int(math.floor(D * sd))
    Ho = int(math.floor(H * sh))
    Wo = int(math.floor(W * sw))
    y = _axis_linear_resize_ref(y, 2, D, Do, sd)
    y = _axis_linear_resize_ref(y, 3, H, Ho, sh)
    y = _axis_linear_resize_ref(y, 4, W, Wo, sw)
    return y


# ----------------------------------------------------------------------------
if __name__ == "__main__":
    in_channels, out_channels = 8, 4
    scale_factor = 2
    N, D, H, W = 2, 16, 16, 16

    key = jax.random.PRNGKey(0)
    kx, kw, kb = jax.random.split(key, 3)

    x = jax.random.normal(kx, (N, in_channels, D, H, W), jnp.float32)
    # PyTorch Conv3d(in, out, kernel_size=1) weight is (out, in, 1, 1, 1); we use
    # the squeezed (out, in) form plus bias.
    weight = jax.random.normal(kw, (out_channels, in_channels), jnp.float32) \
        * (1.0 / in_channels) ** 0.5
    bias = 0.1 * jax.random.normal(kb, (out_channels,), jnp.float32)

    out = deep_supervision_forward(x, weight, bias, scale_factor)
    out = jax.block_until_ready(out)

    ref = jax.block_until_ready(dsv_reference(x, weight, bias, scale_factor))

    assert out.shape == (N, out_channels, D * 2, H * 2, W * 2), out.shape
    max_err = float(jnp.max(jnp.abs(out - ref)))
    assert jnp.allclose(out, ref, atol=1e-3, rtol=1e-3), max_err

    print("KERNEL_OK")
</pallas_src>

<mosaic_0001>
module attributes {stable_mosaic.version = 11 : i64} {
  func.func @_dsv_fused_kernel(%arg0: i32, %arg1: i32, %arg2: memref<1x128x256xf32, #tpu.memory_space<vmem>>, %arg3: memref<128x128xf32, #tpu.memory_space<vmem>>, %arg4: memref<256x1024xf32, #tpu.memory_space<vmem>>, %arg5: memref<128x1xf32, #tpu.memory_space<vmem>>, %arg6: memref<1x128x1024xf32, #tpu.memory_space<vmem>>, %arg7: memref<128x256xf32, #tpu.memory_space<vmem>>) attributes {dimension_semantics = [#tpu.dimension_semantics<parallel>, #tpu.dimension_semantics<arbitrary>], iteration_bounds = array<i64: 2, 1>, scalar_prefetch = 0 : i64, scratch_operands = 1 : i64, tpu.core_type = #tpu.core_type<tc>, window_params = [{transform_indices = @transform_0, window_bounds = array<i64: 1, 128, 256>}, {pipeline_mode = #tpu.pipeline_mode<synchronous>, transform_indices = @transform_1, window_bounds = array<i64: 128, 128>}, {transform_indices = @transform_2, window_bounds = array<i64: 256, 1024>}, {pipeline_mode = #tpu.pipeline_mode<synchronous>, transform_indices = @transform_3, window_bounds = array<i64: 128, 1>}, {transform_indices = @transform_4, window_bounds = array<i64: 1, 128, 1024>}]} {
    %c0_i32 = arith.constant 0 : i32
    %0 = arith.cmpi eq, %arg1, %c0_i32 : i32
    %1 = arith.extui %0 : i1 to i32
    %c0_i32_0 = arith.constant 0 : i32
    %2 = arith.cmpi ne, %1, %c0_i32_0 : i32
    scf.if %2 {
      %c0_7 = arith.constant 0 : index
      %c0_8 = arith.constant 0 : index
      %9 = vector.load %arg3[%c0_7, %c0_8] : memref<128x128xf32, #tpu.memory_space<vmem>>, vector<128x128xf32>
      %c0_9 = arith.constant 0 : index
      %c0_10 = arith.constant 0 : index
      %c0_11 = arith.constant 0 : index
      %10 = vector.load %arg2[%c0_9, %c0_10, %c0_11] : memref<1x128x256xf32, #tpu.memory_space<vmem>>, vector<1x128x256xf32>
      %11 = vector.shape_cast %10 : vector<1x128x256xf32> to vector<128x256xf32>
      %cst_12 = arith.constant dense<0.000000e+00> : vector<128x256xf32>
      %12 = tpu.matmul %9, %11, %cst_12 {dimension_numbers = #tpu.dot_dimension_numbers<[1], [0], [0], [1], [0, 0, 1, 1], [], []>} : vector<128x128xf32>, vector<128x256xf32>, vector<128x256xf32> -> vector<128x256xf32>
      %c0_13 = arith.constant 0 : index
      %c0_14 = arith.constant 0 : index
      %13 = vector.load %arg5[%c0_13, %c0_14] : memref<128x1xf32, #tpu.memory_space<vmem>>, vector<128x1xf32>
      %14 = vector.broadcast %13 : vector<128x1xf32> to vector<128x256xf32>
      %15 = arith.addf %12, %14 : vector<128x256xf32>
      %c0_15 = arith.constant 0 : index
      %c0_16 = arith.constant 0 : index
      %16 = vector.load %arg7[%c0_15, %c0_16] : memref<128x256xf32, #tpu.memory_space<vmem>>, vector<128x256xf32>
      tpu.vector_store %arg7[%c0_15, %c0_16], %15 {strides = array<i32>} : memref<128x256xf32, #tpu.memory_space<vmem>>, vector<128x256xf32>,
    } else {
    }
    %c0 = arith.constant 0 : index
    %c0_1 = arith.constant 0 : index
    %3 = vector.load %arg7[%c0, %c0_1] : memref<128x256xf32, #tpu.memory_space<vmem>>, vector<128x256xf32>
    %c0_2 = arith.constant 0 : index
    %c0_3 = arith.constant 0 : index
    %4 = vector.load %arg4[%c0_2, %c0_3] : memref<256x1024xf32, #tpu.memory_space<vmem>>, vector<256x1024xf32>
    %cst = arith.constant dense<0.000000e+00> : vector<128x1024xf32>
    %5 = tpu.matmul %3, %4, %cst {dimension_numbers = #tpu.dot_dimension_numbers<[1], [0], [0], [1], [0, 0, 1, 1], [], []>} : vector<128x256xf32>, vector<256x1024xf32>, vector<128x1024xf32> -> vector<128x1024xf32>
    %c0_4 = arith.constant 0 : index
    %c0_5 = arith.constant 0 : index
    %c0_6 = arith.constant 0 : index
    %6 = vector.load %arg6[%c0_4, %c0_5, %c0_6] : memref<1x128x1024xf32, #tpu.memory_space<vmem>>, vector<1x128x1024xf32>
    %7 = vector.shape_cast %6 : vector<1x128x1024xf32> to vector<128x1024xf32>
    %8 = vector.shape_cast %5 : vector<128x1024xf32> to vector<1x128x1024xf32>
    tpu.vector_store %arg6[%c0_4, %c0_5, %c0_6], %8 {strides = array<i32>} : memref<1x128x1024xf32, #tpu.memory_space<vmem>>, vector<1x128x1024xf32>,
    return
  }
  func.func @transform_0(%arg0: i32, %arg1: i32) -> (i32, i32, i32) {
    %c0_i32 = arith.constant 0 : i32
    %c0_i32_0 = arith.constant 0 : i32
    %c0_i32_1 = arith.constant 0 : i32
    return %arg0, %c0_i32, %c0_i32_0 : i32, i32, i32
  }
  func.func @transform_1(%arg0: i32, %arg1: i32) -> (i32, i32) {
    %c0_i32 = arith.constant 0 : i32
    %c0_i32_0 = arith.constant 0 : i32
    %c0_i32_1 = arith.constant 0 : i32
    return %c0_i32, %c0_i32_0 : i32, i32
  }
  func.func @transform_2(%arg0: i32, %arg1: i32) -> (i32, i32) {
    %c0_i32 = arith.constant 0 : i32
    %c0_i32_0 = arith.constant 0 : i32
    return %c0_i32, %arg1 : i32, i32
  }
  func.func @transform_3(%arg0: i32, %arg1: i32) -> (i32, i32) {
    %c0_i32 = arith.constant 0 : i32
    %c0_i32_0 = arith.constant 0 : i32
    %c0_i32_1 = arith.constant 0 : i32
    return %c0_i32, %c0_i32_0 : i32, i32
  }
  func.func @transform_4(%arg0: i32, %arg1: i32) -> (i32, i32, i32) {
    %c0_i32 = arith.constant 0 : i32
    %c0_i32_0 = arith.constant 0 : i32
    return %arg0, %c0_i32, %arg1 : i32, i32, i32
  }
}

</mosaic_0001>

<bundles_post_ra>
// kernel: tpu_custom_call.1
= control target key start
LH: loop header
LB: loop body
LE: loop exit
PB: predicated region body
PF: predicated region fallthrough
CT: control target
= control target key end

     0   :  { %s3035_s0 = inlined_call_operand.hbm [shape: f32[2,128,256], index: 0, kind: input, shape index: {}]   ;;  %s3036_s1 = inlined_call_operand.vmem [shape: f32[128,128], index: 1, kind: input, shape index: {}]   ;;  %s3037_s2 = inlined_call_operand.hbm [shape: f32[256,1024], index: 2, kind: input, shape index: {}]   ;;  %s3038_s3 = inlined_call_operand.vmem [shape: f32[128,1], index: 3, kind: input, shape index: {}]   ;;  %s3039_s4 = inlined_call_operand.hbm [shape: f32[2,128,1024], index: 4, kind: output, shape index: {}]  }
   0x1   :  { %3091 = sst [smem:[#allocation48_spill]] %s3037_s2 }
   0x2   :  { %9 = vsyncpa [#allocation4], 0 }
   0x3   :  { %11 = vsyncpa [#allocation4 + $0x1], 0 }
   0x4   :  { %12 = vsyncpa [#allocation7], 0 }
   0x5   :  { %13 = vsyncpa [#allocation5], 0 }
   0x6   :  { %15 = vsyncpa [#allocation5 + $0x1], 0  ;;  %s2110_s15 = smov 0   ;;  %s2112_s16 = smov 0  }
   0x7   :  { %s2114_s17 = smov 0   ;;  %s2116_s18 = smov 0  }
   0x8   :  { %s2118_s19 = smov 0   ;;  %s2120_s20 = smov 0  }
   0x9 LB: > { %s1768_s21 = sadd.s32 4294967295, %s2072_s20   ;;  %s1769_s22 = sadd.s32 4294967294, %s2072_s20   ;;  %s2072_s20 = sphi %s2120_s20, %s21_s20   ;;  %s2068_s19 = sphi %s2118_s19, %s3181_s19   ;;  %s2064_s18 = sphi %s2116_s18, %s3180_s18   ;;  %s2060_s17 = sphi %s2114_s17, %s3179_s17   ;;  %s2056_s16 = sphi %s2112_s16, %s3178_s16   ;;  %s2052_s15 = sphi %s2110_s15, %s3177_s15  }
   0xa   : > { %p53_p0 = scmp.ne.s32.totalorder %s2056_s16, %s2052_s15  ;;  %p2144_p1 = scmp.eq.s32.totalorder %s1768_s21, 0 }
   0xb   : > { %p2148_p2 = scmp.eq.s32.totalorder %s1768_s21, 1  ;;  %p153_p3 = scmp.eq.s32.totalorder %s1769_s22, 1 }
   0xc   : > { %p2154_p4 = por %p2144_p1, %p53_p0  ;;  %p1770_p5 = scmp.ge.s32.totalorder %s2072_s20, 1 }
   0xd   : > { %p2159_p6 = por %p153_p3, %p53_p0  ;;  %p160_p7 = scmp.lt.s32.totalorder %s2072_s20, 3 }
   0xe   : > { %s3094_s25 = scalar_select %p2154_p4, 1, 0 }
   0xf   : > { %s3095_s26 = scalar_select %p2159_p6, 1, 0 }
  0x10   : > { %p2164_p8 = pnand %p1770_p5, %p160_p7  ;;  %s2074_s28 = smov [#allocation6]  }
  0x11   : > { %s178_s29 = sshll.u32 %s2074_s28, 4  ;;  %s33_s5 = sadd.s32 1, %s2068_s19  ;;  %s179_s29 = int_to_ptr.vmem [resolvable:$true] %s178_s29 }
  0x12   : > { %p1859_p9 = pneg %p2164_p8  ;;  %s1945_s6 = scalar_lea.vmem %s179_s29, 32768 }
  0x13   : > { %p1946_p13 = scmp.ne.s32.totalorder %s179_s29, %s1945_s6  ;;  %p1953_p5 = scmp.lt.s32.totalorder %s179_s29, %s179_s29 }
  0x14   : > { %p2173_p11 = pnand %p1859_p9, %p2144_p1  ;;  %p1954_p7 = scmp.lt.s32.totalorder %s1945_s6, %s1945_s6 }
  0x16   : > { %p1936_p12 = pneg %p2173_p11  ;;  %p1955_p6 = por %p1954_p7, %p1953_p5 }
  0x18   : > { %p1948_p0 = pnand %p1946_p13, %p1936_p12 }
  0x1a   : > { %p1949_p3 = pneg %p1948_p0 }
  0x1c   : > { %p1956_p4 = pnand %p1955_p6, %p1949_p3 }
  0x1e   : > { %1959 = shalt.err (!%p1956_p4)
}
  0x1f   : > { %s2075_s7 = smov 1024   ;;  %s2076_s8 = smov 64  }
  0x20   : > { %s3098_s2 = sld [smem:[#allocation48_spill]]  ;;  %p35_p6 = scmp.ge.s32.totalorder %s33_s5, 2 }
  0x21   : > { %s40_s11 = sadd.s32 1, %s2060_s17  ;;  %p47_p4 = scmp.ne.s32.totalorder %s2060_s17, %s2056_s16 }
  0x22   : > { %p48_p9 = scmp.eq.s32.totalorder %s2072_s20, 0  ;;  %s3183_s5 = smov (%p35_p6, %s33_s5), 0 }
  0x23   : > { %p2197_p13 = por %p2148_p2, %p47_p4  ;;  %s37_s14 = ssub.s32 %s2068_s19, %s3183_s5 }
  0x24   : > { %p2191_p12 = por %p48_p9, %p47_p4  ;;  %p1872_p0 = scmp.lt.s32.totalorder %s2072_s20, 2 }
  0x25   : > { %s195_s21 = sand.u32 1, %s2060_s17  }
  0x26   : > { %1862 = dma.hbm_to_vmem [thread:$0]  (!%p2173_p11), %s3098_s2, 32768, %s179_s29, [#allocation7], %s2075_s7, %s2075_s7, %s2076_s8  }
  0x27   : > { %p38_p11 = scmp.eq.s32.totalorder %s37_s14, 0  ;;  %s1773_s22 = sshll.u32 %s195_s21, 8 }
  0x28   : > { %s1785_s29 = sshll.u32 %s2068_s19, 12  ;;  %s199_s8 = scalar_lea.vmem [#allocation3], %s1773_s22 }
  0x29   : > { %s2206_s28 = scalar_select %p38_p11, %s2060_s17, %s40_s11  }
  0x2a   : > { %s205_s7 = scalar_lea.hbm %s3035_s0, %s1785_s29  ;;  %s206_s9 = sshll.u32 %s199_s8, 4  ;;  %s207_s9 = int_to_ptr.vmem [resolvable:$true] %s206_s9 }
  0x2b   : > { %p2214_p2 = pnand %p1872_p0, %p2191_p12  ;;  %s196_s10 = scalar_lea.sflag [#allocation4], %s195_s21 }
  0x2c   : > { %s1973_s14 = scalar_lea.vmem %s207_s9, 4096  ;;  %s2077_s11 = smov [#allocation3]  }
  0x2d   : > { %p1962_p3 = pneg %p2214_p2  ;;  %p1974_p5 = scmp.ne.s32.totalorder %s207_s9, %s1973_s14 }
  0x2e   : > { %s1978_s2 = sshll.u32 %s2077_s11, 4  ;;  %s1979_s2 = int_to_ptr.vmem [resolvable:$false] %s1978_s2 }
  0x2f   : > { %p1976_p7 = pnand %p1974_p5, %p1962_p3  ;;  %s1980_s29 = scalar_lea.vmem %s1979_s2, 8192 }
  0x30   : > { %p1981_p4 = scmp.lt.s32.totalorder %s207_s9, %s1979_s2  ;;  %p1982_p9 = scmp.lt.s32.totalorder %s1980_s29, %s1973_s14 }
  0x31   : > { %p1977_p6 = pneg %p1976_p7 }
  0x32   : > { %p1983_p11 = por %p1982_p9, %p1981_p4 }
  0x34   : > { %p1984_p10 = pnand %p1983_p11, %p1977_p6 }
  0x36   : > { %1987 = shalt.err (!%p1984_p10)
}
  0x37   : > { %s2078_s12 = smov 256   ;;  %s2079_s22 = smov 16  }
  0x38   : > { %1866 = dma.hbm_to_vmem [thread:$0]  (!%p2214_p2), %s205_s7, 4096, %s207_s9, %s196_s10, %s2078_s12, %s2078_s12, %s2079_s22  }
  0x39   : > { %218 = sbr.rel (%p2164_p8) target bundleno = 680 (0x2a8), region = 36 }
  0x3e   : > { %s2225_s21 = sand.u32 1, %s2056_s16   ;;  %p3102_p12 = scmp.ne.s32.totalorder %s3094_s25, 0 }
  0x3f   : > { %s1777_s30 = sshll.u32 %s2225_s21, 8  ;;  %s221_s2 = scalar_lea.sflag [#allocation4], %s2225_s21 }
  0x40   : > { %s2229_s6 = scalar_lea.vmem [#allocation3], %s1777_s30 }
  0x41   : > { %2039 = dma.done.wait (%p3102_p12), %s221_s2, 4096  }
  0x42   : > { %2041 = vsyncadd (%p3102_p12), %s221_s2, 4294963200 }
  0x43   : > { %2043 = dma.done.wait (%p2144_p1), [#allocation7], 32768  }
  0x44   : > { %2045 = vsyncadd (%p2144_p1), [#allocation7], 4294934528  ;;  %v2080_v0 = vmov 0.0   ;;  %v2081_v1 = vmov 0   ;;  %v306_v2 = vld [vmem:[%s2229_s6 + $0xf8] sm:$0xff]  ;;  %v305_v3 = vld [vmem:[%s2229_s6 + $0xf0] sm:$0xff] }
  0x45   : > { %467 = vmatprep.mubr.f32.mxu0 %v2080_v0  ;;  %1932 = vset.pattern.permute.xlu0 %v2081_v1  ;;  %v304_v4 = vld [vmem:[%s2229_s6 + $0xe8] sm:$0xff]  ;;  %v303_v5 = vld [vmem:[%s2229_s6 + $0xe0] sm:$0xff]  ;;  %v302_v6 = vld [vmem:[%s2229_s6 + $0xd8] sm:$0xff]  ;;  %s1779_s25 = sshll.u32 %s2225_s21, 10  ;;  %s1786_s7 = sshll.u32 %s2064_s18, 14 }
  0x46   : > { %1933 = vset.pattern.permute.xlu1 %v2081_v1  ;;  %403 = vmatprep.subr.mxu0 %v306_v2  ;;  %v301_v7 = vld [vmem:[%s2229_s6 + $0xd0] sm:$0xff]  ;;  %v300_v8 = vld [vmem:[%s2229_s6 + $0xc8] sm:$0xff]  ;;  %v299_v9 = vld [vmem:[%s2229_s6 + $0xc0] sm:$0xff]  ;;  %s2850_s27 = scalar_lea.vmem [#allocation8], %s1779_s25  ;;  %s2983_s10 = scalar_lea.hbm %s3039_s4, %s1786_s7 }
  0x47   : > { %404 = vmatpush1.msra.mxu0 %v305_v3  ;;  %v298_v10 = vld [vmem:[%s2229_s6 + $0xb8] sm:$0xff]  ;;  %v297_v11 = vld [vmem:[%s2229_s6 + $0xb0] sm:$0xff]  ;;  %v296_v12 = vld [vmem:[%s2229_s6 + $0xa8] sm:$0xff]  ;;  %s1672_s8 = sshll.u32 %s2850_s27, 4  ;;  %s1657_s14 = scalar_lea.sflag [#allocation5], %s2225_s21  ;;  %s2985_s8 = int_to_ptr.vmem [resolvable:$true] %s1672_s8 }
  0x48   : > { %405 = vmatprep.subr.mxu0 %v304_v4  ;;  %v295_v13 = vld [vmem:[%s2229_s6 + $0xa0] sm:$0xff]  ;;  %v294_v14 = vld [vmem:[%s2229_s6 + $0x98] sm:$0xff]  ;;  %v293_v15 = vld [vmem:[%s2229_s6 + $0x90] sm:$0xff]  ;;  %s2082_s18 = smov [#allocation8]  }
  0x49   : > { %406 = vmatpush1.msra.mxu0 %v303_v5  ;;  %v292_v16 = vld [vmem:[%s2229_s6 + $0x88] sm:$0xff]  ;;  %v291_v17 = vld [vmem:[%s2229_s6 + $0x80] sm:$0xff]  ;;  %v290_v18 = vld [vmem:[%s2229_s6 + $0x78] sm:$0xff]  ;;  %s1992_s11 = sshll.u32 %s2082_s18, 4  ;;  %s1993_s11 = int_to_ptr.vmem [resolvable:$false] %s1992_s11 }
  0x4a   : > { %407 = vmatprep.subr.mxu0 %v302_v6  ;;  %v307_v19 = vld [vmem:[%s3038_s3] sm:$0xff]  ;;  %v289_v20 = vld [vmem:[%s2229_s6 + $0x70] sm:$0xff]  ;;  %v288_v22 = vld [vmem:[%s2229_s6 + $0x68] sm:$0xff]  ;;  %s1994_s29 = scalar_lea.vmem %s1993_s11, 32768  ;;  %p1995_p0 = scmp.lt.s32.totalorder %s2985_s8, %s1993_s11 }
  0x4b   : > { %408 = vmatpush1.msra.mxu0 %v301_v7  ;;  %325 = vperm.xlu0 %1932, %v307_v19   ;;  %v309_v21 = vld [vmem:[%s3038_s3 + $0x10] sm:$0xff]  ;;  %v308_v23 = vld [vmem:[%s3038_s3 + $0x8] sm:$0xff]  ;;  %v287_v24 = vld [vmem:[%s2229_s6 + $0x60] sm:$0xff] }
  0x4c   : > { %409 = vmatprep.subr.mxu0 %v300_v8  ;;  %335 = vperm.xlu1 %1933, %v309_v21   ;;  %v310_v25 = vld [vmem:[%s3038_s3 + $0x18] sm:$0xff]  ;;  %v285_v27 = vld [vmem:[%s2229_s6 + $0x50] sm:$0xff]  ;;  %v284_v28 = vld [vmem:[%s2229_s6 + $0x48] sm:$0xff] }
  0x4d   : > { %410 = vmatpush1.msra.mxu0 %v299_v9  ;;  %v286_v26 = vld [vmem:[%s2229_s6 + $0x58] sm:$0xff]  ;;  %v311_v29 = vld [vmem:[%s3038_s3 + $0x20] sm:$0xff]  ;;  %v312_v31 = vld [vmem:[%s3038_s3 + $0x28] sm:$0xff] }
  0x4e   : > { %411 = vmatprep.subr.mxu0 %v298_v10  ;;  %v283_v30 = vld [vmem:[%s2229_s6 + $0x40] sm:$0xff]  ;;  %v749_v32 = vld [vmem:[#allocation6 + $0x3c8] sm:$0xff]  ;;  %v282_v33 = vld [vmem:[%s2229_s6 + $0x38] sm:$0xff] }
  0x4f   : > { %412 = vmatpush1.msra.mxu0 %v297_v11  ;;  %330 = vperm.xlu0 %1932, %v308_v23   ;;  %v748_v34 = vld [vmem:[#allocation6 + $0x3c0] sm:$0xff]  ;;  %v281_v35 = vld [vmem:[%s2229_s6 + $0x30] sm:$0xff]  ;;  %v741_v36 = vld [vmem:[#allocation6 + $0x388] sm:$0xff] }
  0x50   : > { %413 = vmatprep.subr.mxu0 %v296_v12  ;;  %340 = vperm.xlu1 %1933, %v310_v25   ;;  %v280_v37 = vld [vmem:[%s2229_s6 + $0x28] sm:$0xff]  ;;  %v313_v38 = vld [vmem:[%s3038_s3 + $0x30] sm:$0xff]  ;;  %v279_v39 = vld [vmem:[%s2229_s6 + $0x20] sm:$0xff] }
  0x51   : > { %414 = vmatpush1.msra.mxu0 %v295_v13  ;;  %884 = vmatprep.subr.mxu1 %v749_v32  ;;  %v314_v40 = vld [vmem:[%s3038_s3 + $0x38] sm:$0xff]  ;;  %v740_v42 = vld [vmem:[#allocation6 + $0x380] sm:$0xff]  ;;  %v277_v43 = vld [vmem:[%s2229_s6 + $0x10] sm:$0xff] }
  0x52   : > { %415 = vmatprep.subr.mxu0 %v294_v14  ;;  %885 = vmatpush1.msra.mxu1 %v748_v34  ;;  %v278_v41 = vld [vmem:[%s2229_s6 + $0x18] sm:$0xff]  ;;  %v733_v44 = vld [vmem:[#allocation6 + $0x348] sm:$0xff]  ;;  %v315_v46 = vld [vmem:[%s3038_s3 + $0x40] sm:$0xff] }
  0x53   : > { %416 = vmatpush1.msra.mxu0 %v293_v15  ;;  %345 = vperm.xlu0 %1932, %v311_v29   ;;  %v276_v45 = vld [vmem:[%s2229_s6 + $0x8] sm:$0xff]  ;;  %v275_v47 = vld [vmem:[%s2229_s6] sm:$0xff]  ;;  %v751_v50 = vld [vmem:[#allocation6 + $0x3d8] sm:$0xff]  ;;  %s1988_s6 = scalar_lea.vmem %s2985_s8, 16384 }
  0x54   : > { %417 = vmatprep.subr.mxu0 %v292_v16  ;;  %350 = vperm.xlu1 %1933, %v312_v31   ;;  %v316_v48 = vld [vmem:[%s3038_s3 + $0x48] sm:$0xff]  ;;  %v259_v49 = vld [vmem:[%s3036_s1] sm:$0xff]  ;;  %v750_v51 = vld [vmem:[#allocation6 + $0x3d0] sm:$0xff]  ;;  %p1989_p1 = scmp.ne.s32.totalorder %s2985_s8, %s1988_s6  ;;  %p1996_p2 = scmp.lt.s32.totalorder %s1994_s29, %s1988_s6 }
  0x55   : > { %418 = vmatpush1.msra.mxu0 %v291_v17  ;;  %886 = vmatprep.subr.mxu1 %v741_v36  ;;  %v317_v52 = vld [vmem:[%s3038_s3 + $0x50] sm:$0xff]  ;;  %v743_v53 = vld [vmem:[#allocation6 + $0x398] sm:$0xff]  ;;  %v260_v56 = vld [vmem:[%s3036_s1 + $0x8] sm:$0xff] }
  0x56   : > { %419 = vmatprep.subr.mxu0 %v290_v18  ;;  %887 = vmatpush1.msra.mxu1 %v740_v42  ;;  %v318_v54 = vld [vmem:[%s3038_s3 + $0x58] sm:$0xff]  ;;  %v742_v55 = vld [vmem:[#allocation6 + $0x390] sm:$0xff]  ;;  %v732_v57 = vld [vmem:[#allocation6 + $0x340] sm:$0xff]  ;;  %p1990_p8 = pnand %p1989_p1, %p2197_p13  ;;  %p1997_p3 = por %p1996_p2, %p1995_p0 }
  0x57   : > { %420 = vmatpush1.msra.mxu0 %v289_v20  ;;  %355 = vperm.xlu0 %1932, %v313_v38   ;;  %v735_v58 = vld [vmem:[#allocation6 + $0x358] sm:$0xff]  ;;  %v319_v59 = vld [vmem:[%s3038_s3 + $0x60] sm:$0xff]  ;;  %v725_v60 = vld [vmem:[#allocation6 + $0x308] sm:$0xff] }
  0x58   : > { %421 = vmatprep.subr.mxu0 %v288_v22  ;;  %360 = vperm.xlu1 %1933, %v314_v40   ;;  %v320_v61 = vld [vmem:[%s3038_s3 + $0x68] sm:$0xff]  ;;  %v734_v62 = vld [vmem:[#allocation6 + $0x350] sm:$0xff]  ;;  %v724_v1 = vld [vmem:[#allocation6 + $0x300] sm:$0xff]  ;;  %p1991_p10 = pneg %p1990_p8 }
  0x59   : > { %422 = vmatpush1.msra.mxu0 %v287_v24  ;;  %888 = vmatprep.subr.mxu1 %v733_v44  ;;  %v261_v63 = vld [vmem:[%s3036_s1 + $0x10] sm:$0xff]  ;;  %v727_v2 = vld [vmem:[#allocation6 + $0x318] sm:$0xff]  ;;  %v717_v4 = vld [vmem:[#allocation6 + $0x2c8] sm:$0xff] }
  0x5a   : > { %423 = vmatprep.subr.mxu0 %v286_v26  ;;  %889 = vmatpush1.msra.mxu1 %v732_v57  ;;  %v321_v3 = vld [vmem:[%s3038_s3 + $0x70] sm:$0xff]  ;;  %v322_v5 = vld [vmem:[%s3038_s3 + $0x78] sm:$0xff]  ;;  %v716_v8 = vld [vmem:[#allocation6 + $0x2c0] sm:$0xff]  ;;  %p1998_p5 = pnand %p1997_p3, %p1991_p10 }
  0x5b   : > { %424 = vmatpush1.msra.mxu0 %v285_v27  ;;  %365 = vperm.xlu0 %1932, %v315_v46   ;;  %v726_v6 = vld [vmem:[#allocation6 + $0x310] sm:$0xff]  ;;  %v262_v7 = vld [vmem:[%s3036_s1 + $0x18] sm:$0xff]  ;;  %v709_v10 = vld [vmem:[#allocation6 + $0x288] sm:$0xff] }
  0x5c   : > { %425 = vmatprep.subr.mxu0 %v284_v28  ;;  %370 = vperm.xlu1 %1933, %v316_v48   ;;  %v719_v9 = vld [vmem:[#allocation6 + $0x2d8] sm:$0xff]  ;;  %v718_v11 = vld [vmem:[#allocation6 + $0x2d0] sm:$0xff]  ;;  %v708_v12 = vld [vmem:[#allocation6 + $0x280] sm:$0xff] }
  0x5d   : > { %426 = vmatpush1.msra.mxu0 %v283_v30  ;;  %890 = vmatprep.subr.mxu1 %v725_v60  ;;  %v711_v13 = vld [vmem:[#allocation6 + $0x298] sm:$0xff]  ;;  %v263_v14 = vld [vmem:[%s3036_s1 + $0x20] sm:$0xff]  ;;  %v701_v15 = vld [vmem:[#allocation6 + $0x248] sm:$0xff] }
  0x5e   : > { %427 = vmatprep.subr.mxu0 %v282_v33  ;;  %891 = vmatpush1.msra.mxu1 %v724_v1  ;;  %v710_v16 = vld [vmem:[#allocation6 + $0x290] sm:$0xff]  ;;  %v700_v17 = vld [vmem:[#allocation6 + $0x240] sm:$0xff]  ;;  %v703_v18 = vld [vmem:[#allocation6 + $0x258] sm:$0xff] }
  0x5f   : > { %428 = vmatpush1.msra.mxu0 %v281_v35  ;;  %375 = vperm.xlu0 %1932, %v317_v52   ;;  %v693_v19 = vld [vmem:[#allocation6 + $0x208] sm:$0xff]  ;;  %v702_v20 = vld [vmem:[#allocation6 + $0x250] sm:$0xff]  ;;  %v692_v22 = vld [vmem:[#allocation6 + $0x200] sm:$0xff] }
  0x60   : > { %429 = vmatprep.subr.mxu0 %v280_v37  ;;  %380 = vperm.xlu1 %1933, %v318_v54   ;;  %v264_v21 = vld [vmem:[%s3036_s1 + $0x28] sm:$0xff]  ;;  %v695_v23 = vld [vmem:[#allocation6 + $0x218] sm:$0xff]  ;;  %v694_v25 = vld [vmem:[#allocation6 + $0x210] sm:$0xff] }
  0x61   : > { %430 = vmatpush1.msra.mxu0 %v279_v39  ;;  %892 = vmatprep.subr.mxu1 %v717_v4  ;;  %v685_v24 = vld [vmem:[#allocation6 + $0x1c8] sm:$0xff]  ;;  %v684_v26 = vld [vmem:[#allocation6 + $0x1c0] sm:$0xff]  ;;  %v687_v27 = vld [vmem:[#allocation6 + $0x1d8] sm:$0xff] }
  0x62   : > { %431 = vmatprep.subr.mxu0 %v278_v41  ;;  %893 = vmatpush1.msra.mxu1 %v716_v8  ;;  %v265_v28 = vld [vmem:[%s3036_s1 + $0x30] sm:$0xff]  ;;  %v677_v29 = vld [vmem:[#allocation6 + $0x188] sm:$0xff]  ;;  %v676_v31 = vld [vmem:[#allocation6 + $0x180] sm:$0xff] }
  0x63   : > { %432 = vmatpush1.msra.mxu0 %v277_v43  ;;  %385 = vperm.xlu0 %1932, %v319_v59   ;;  %v686_v30 = vld [vmem:[#allocation6 + $0x1d0] sm:$0xff]  ;;  %v679_v32 = vld [vmem:[#allocation6 + $0x198] sm:$0xff]  ;;  %v669_v33 = vld [vmem:[#allocation6 + $0x148] sm:$0xff] }
  0x64   : > { %433 = vmatprep.subr.mxu0 %v276_v45  ;;  %390 = vperm.xlu1 %1933, %v320_v61   ;;  %v678_v34 = vld [vmem:[#allocation6 + $0x190] sm:$0xff]  ;;  %v266_v35 = vld [vmem:[%s3036_s1 + $0x38] sm:$0xff]  ;;  %v668_v36 = vld [vmem:[#allocation6 + $0x140] sm:$0xff] }
  0x65   : > { %434 = vmatpush1.msra.mxu0 %v275_v47  ;;  %894 = vmatprep.subr.mxu1 %v709_v10  ;;  %v671_v37 = vld [vmem:[#allocation6 + $0x158] sm:$0xff]  ;;  %v661_v38 = vld [vmem:[#allocation6 + $0x108] sm:$0xff]  ;;  %v670_v39 = vld [vmem:[#allocation6 + $0x150] sm:$0xff] }
  0x66   : > { %468 = vmatmul.mubr.f32.vlgmr.msra.gmra.mxu0 %v259_v49  ;;  %1045 = vmatprep.subr.mxu0 %v751_v50  ;;  %v660_v40 = vld [vmem:[#allocation6 + $0x100] sm:$0xff]  ;;  %v663_v41 = vld [vmem:[#allocation6 + $0x118] sm:$0xff]  ;;  %v653_v43 = vld [vmem:[#allocation6 + $0xc8] sm:$0xff] }
  0x67   : > { %473 = vmatprep.mubr.f32.mxu0 %v2080_v0  ;;  %1046 = vmatpush1.msra.mxu0 %v750_v51  ;;  %v267_v42 = vld [vmem:[%s3036_s1 + $0x40] sm:$0xff]  ;;  %v662_v44 = vld [vmem:[#allocation6 + $0x110] sm:$0xff]  ;;  %v655_v46 = vld [vmem:[#allocation6 + $0xd8] sm:$0xff] }
  0x68   : > { %1047 = vmatprep.subr.mxu0 %v743_v53  ;;  %395 = vperm.xlu0 %1932, %v321_v3   ;;  %v652_v45 = vld [vmem:[#allocation6 + $0xc0] sm:$0xff]  ;;  %v645_v47 = vld [vmem:[#allocation6 + $0x88] sm:$0xff]  ;;  %v654_v48 = vld [vmem:[#allocation6 + $0xd0] sm:$0xff] }
  0x69   : > { %1048 = vmatpush1.msra.mxu0 %v742_v55  ;;  %400 = vperm.xlu1 %1933, %v322_v5   ;;  %v268_v49 = vld [vmem:[%s3036_s1 + $0x48] sm:$0xff]  ;;  %v644_v50 = vld [vmem:[#allocation6 + $0x80] sm:$0xff]  ;;  %v647_v51 = vld [vmem:[#allocation6 + $0x98] sm:$0xff] }
  0x6a   : > { %474 = vmatmul.mubr.f32.gmra.mxu0 %v260_v56  ;;  %1049 = vmatprep.subr.mxu0 %v735_v58  ;;  %v637_v52 = vld [vmem:[#allocation6 + $0x48] sm:$0xff]  ;;  %v646_v53 = vld [vmem:[#allocation6 + $0x90] sm:$0xff]  ;;  %v636_v54 = vld [vmem:[#allocation6 + $0x40] sm:$0xff] }
  0x6b   : > { %479 = vmatprep.mubr.f32.mxu0 %v2080_v0  ;;  %1050 = vmatpush1.msra.mxu0 %v734_v62  ;;  %v639_v55 = vld [vmem:[#allocation6 + $0x58] sm:$0xff]  ;;  %v269_v56 = vld [vmem:[%s3036_s1 + $0x50] sm:$0xff]  ;;  %v629_v57 = vld [vmem:[#allocation6 + $0x8] sm:$0xff] }
  0x6c   : > { %1051 = vmatprep.subr.mxu0 %v727_v2  ;;  %895 = vmatpush1.msra.mxu1 %v708_v12  ;;  %v638_v58 = vld [vmem:[#allocation6 + $0x50] sm:$0xff]  ;;  %v628_v59 = vld [vmem:[#allocation6] sm:$0xff]  ;;  %v631_v60 = vld [vmem:[#allocation6 + $0x18] sm:$0xff] }
  0x6d   : > { %1052 = vmatpush1.msra.mxu0 %v726_v6  ;;  %896 = vmatprep.subr.mxu1 %v701_v15  ;;  %v877_v61 = vld [vmem:[#allocation6 + $0x7c8] sm:$0xff]  ;;  %v630_v62 = vld [vmem:[#allocation6 + $0x10] sm:$0xff]  ;;  %v876_v1 = vld [vmem:[#allocation6 + $0x7c0] sm:$0xff] }
  0x6e   : > { %480 = vmatmul.mubr.f32.gmra.mxu0 %v261_v63  ;;  %1053 = vmatprep.subr.mxu0 %v719_v9  ;;  %v270_v63 = vld [vmem:[%s3036_s1 + $0x58] sm:$0xff]  ;;  %v869_v3 = vld [vmem:[#allocation6 + $0x788] sm:$0xff]  ;;  %v878_v4 = vld [vmem:[#allocation6 + $0x7d0] sm:$0xff] }
  0x6f   : > { %485 = vmatprep.mubr.f32.mxu0 %v2080_v0  ;;  %1054 = vmatpush1.msra.mxu0 %v718_v11  ;;  %v879_v2 = vld [vmem:[#allocation6 + $0x7d8] sm:$0xff]  ;;  %v868_v5 = vld [vmem:[#allocation6 + $0x780] sm:$0xff]  ;;  %v861_v8 = vld [vmem:[#allocation6 + $0x748] sm:$0xff] }
  0x70   : > { %1055 = vmatprep.subr.mxu0 %v711_v13  ;;  %897 = vmatpush1.msra.mxu1 %v700_v17  ;;  %v871_v6 = vld [vmem:[#allocation6 + $0x798] sm:$0xff]  ;;  %v870_v9 = vld [vmem:[#allocation6 + $0x790] sm:$0xff]  ;;  %v860_v10 = vld [vmem:[#allocation6 + $0x740] sm:$0xff] }
  0x71   : > { %1056 = vmatpush1.msra.mxu0 %v710_v16  ;;  %898 = vmatprep.subr.mxu1 %v693_v19  ;;  %v863_v11 = vld [vmem:[#allocation6 + $0x758] sm:$0xff]  ;;  %v853_v12 = vld [vmem:[#allocation6 + $0x708] sm:$0xff]  ;;  %v862_v13 = vld [vmem:[#allocation6 + $0x750] sm:$0xff] }
  0x72   : > { %486 = vmatmul.mubr.f32.gmra.mxu0 %v262_v7  ;;  %1057 = vmatprep.subr.mxu0 %v703_v18  ;;  %v271_v7 = vld [vmem:[%s3036_s1 + $0x60] sm:$0xff]  ;;  %v855_v16 = vld [vmem:[#allocation6 + $0x718] sm:$0xff]  ;;  %v845_v17 = vld [vmem:[#allocation6 + $0x6c8] sm:$0xff] }
  0x73   : > { %491 = vmatprep.mubr.f32.mxu0 %v2080_v0  ;;  %1058 = vmatpush1.msra.mxu0 %v702_v20  ;;  %v852_v15 = vld [vmem:[#allocation6 + $0x700] sm:$0xff]  ;;  %v854_v18 = vld [vmem:[#allocation6 + $0x710] sm:$0xff]  ;;  %v847_v20 = vld [vmem:[#allocation6 + $0x6d8] sm:$0xff] }
  0x74   : > { %899 = vmatpush1.msra.mxu1 %v692_v22  ;;  %1059 = vmatprep.subr.mxu0 %v695_v23  ;;  %v844_v19 = vld [vmem:[#allocation6 + $0x6c0] sm:$0xff]  ;;  %v837_v22 = vld [vmem:[#allocation6 + $0x688] sm:$0xff]  ;;  %v846_v23 = vld [vmem:[#allocation6 + $0x6d0] sm:$0xff] }
  0x75   : > { %900 = vmatprep.subr.mxu1 %v685_v24  ;;  %1060 = vmatpush1.msra.mxu0 %v694_v25  ;;  %v836_v24 = vld [vmem:[#allocation6 + $0x680] sm:$0xff]  ;;  %v839_v25 = vld [vmem:[#allocation6 + $0x698] sm:$0xff] }
  0x76   : > { %492 = vmatmul.mubr.f32.gmra.mxu0 %v263_v14  ;;  %901 = vmatpush1.msra.mxu1 %v684_v26  ;;  %v272_v14 = vld [vmem:[%s3036_s1 + $0x68] sm:$0xff] }
  0x77   : > { %497 = vmatprep.mubr.f32.mxu0 %v2080_v0  ;;  %1061 = vmatprep.subr.mxu0 %v687_v27  ;;  %v829_v26 = vld [vmem:[#allocation6 + $0x648] sm:$0xff]  ;;  %v838_v27 = vld [vmem:[#allocation6 + $0x690] sm:$0xff] }
  0x78   : > { %902 = vmatprep.subr.mxu1 %v677_v29  ;;  %1062 = vmatpush1.msra.mxu0 %v686_v30  ;;  %v828_v29 = vld [vmem:[#allocation6 + $0x640] sm:$0xff]  ;;  %v831_v30 = vld [vmem:[#allocation6 + $0x658] sm:$0xff] }
  0x79   : > { %903 = vmatpush1.msra.mxu1 %v676_v31  ;;  %1063 = vmatprep.subr.mxu0 %v679_v32  ;;  %v821_v31 = vld [vmem:[#allocation6 + $0x608] sm:$0xff]  ;;  %v830_v32 = vld [vmem:[#allocation6 + $0x650] sm:$0xff] }
  0x7a   : > { %498 = vmatmul.mubr.f32.gmra.mxu0 %v264_v21  ;;  %904 = vmatprep.subr.mxu1 %v669_v33  ;;  %v273_v21 = vld [vmem:[%s3036_s1 + $0x70] sm:$0xff]  ;;  %v820_v33 = vld [vmem:[#allocation6 + $0x600] sm:$0xff] }
  0x7b   : > { %503 = vmatprep.mubr.f32.mxu0 %v2080_v0  ;;  %1064 = vmatpush1.msra.mxu0 %v678_v34  ;;  %v823_v34 = vld [vmem:[#allocation6 + $0x618] sm:$0xff] }
  0x7c   : > { %905 = vmatpush1.msra.mxu1 %v668_v36  ;;  %1065 = vmatprep.subr.mxu0 %v671_v37  ;;  %v812_v36 = vld [vmem:[#allocation6 + $0x5c0] sm:$0xff]  ;;  %v815_v37 = vld [vmem:[#allocation6 + $0x5d8] sm:$0xff] }
  0x7d   : > { %906 = vmatprep.subr.mxu1 %v661_v38  ;;  %1066 = vmatpush1.msra.mxu0 %v670_v39  ;;  %v805_v38 = vld [vmem:[#allocation6 + $0x588] sm:$0xff]  ;;  %v814_v39 = vld [vmem:[#allocation6 + $0x5d0] sm:$0xff] }
  0x7e   : > { %504 = vmatmul.mubr.f32.gmra.mxu0 %v265_v28  ;;  %907 = vmatpush1.msra.mxu1 %v660_v40  ;;  %v274_v28 = vld [vmem:[%s3036_s1 + $0x78] sm:$0xff]  ;;  %v804_v40 = vld [vmem:[#allocation6 + $0x580] sm:$0xff] }
  0x7f   : > { %509 = vmatprep.mubr.f32.mxu0 %v2080_v0  ;;  %1067 = vmatprep.subr.mxu0 %v663_v41  ;;  %v807_v41 = vld [vmem:[#allocation6 + $0x598] sm:$0xff] }
  0x80   : > { %908 = vmatprep.subr.mxu1 %v653_v43  ;;  %1068 = vmatpush1.msra.mxu0 %v662_v44  ;;  %v806_v43 = vld [vmem:[#allocation6 + $0x590] sm:$0xff]  ;;  %v796_v44 = vld [vmem:[#allocation6 + $0x540] sm:$0xff] }
  0x81   : > { %909 = vmatpush1.msra.mxu1 %v652_v45  ;;  %1069 = vmatprep.subr.mxu0 %v655_v46  ;;  %v799_v45 = vld [vmem:[#allocation6 + $0x558] sm:$0xff]  ;;  %v789_v46 = vld [vmem:[#allocation6 + $0x508] sm:$0xff] }
  0x82   : > { %510 = vmatmul.mubr.f32.gmra.mxu0 %v266_v35  ;;  %910 = vmatprep.subr.mxu1 %v645_v47  ;;  %v813_v35 = vld [vmem:[#allocation6 + $0x5c8] sm:$0xff]  ;;  %v798_v47 = vld [vmem:[#allocation6 + $0x550] sm:$0xff] }
  0x83   : > { %515 = vmatprep.mubr.f32.mxu0 %v2080_v0  ;;  %1070 = vmatpush1.msra.mxu0 %v654_v48  ;;  %v788_v48 = vld [vmem:[#allocation6 + $0x500] sm:$0xff] }
  0x84   : > { %911 = vmatpush1.msra.mxu1 %v644_v50  ;;  %1071 = vmatprep.subr.mxu0 %v647_v51  ;;  %v781_v50 = vld [vmem:[#allocation6 + $0x4c8] sm:$0xff]  ;;  %v790_v51 = vld [vmem:[#allocation6 + $0x510] sm:$0xff] }
  0x85   : > { %912 = vmatprep.subr.mxu1 %v637_v52  ;;  %1072 = vmatpush1.msra.mxu0 %v646_v53  ;;  %v780_v52 = vld [vmem:[#allocation6 + $0x4c0] sm:$0xff]  ;;  %v783_v53 = vld [vmem:[#allocation6 + $0x4d8] sm:$0xff] }
  0x86   : > { %516 = vmatmul.mubr.f32.gmra.mxu0 %v267_v42  ;;  %913 = vmatpush1.msra.mxu1 %v636_v54  ;;  %v797_v42 = vld [vmem:[#allocation6 + $0x548] sm:$0xff] }
  0x87   : > { %521 = vmatprep.mubr.f32.mxu0 %v2080_v0  ;;  %1073 = vmatprep.subr.mxu0 %v639_v55  ;;  %v773_v54 = vld [vmem:[#allocation6 + $0x488] sm:$0xff]  ;;  %v782_v55 = vld [vmem:[#allocation6 + $0x4d0] sm:$0xff] }
  0x88   : > { %914 = vmatprep.subr.mxu1 %v629_v57  ;;  %1074 = vmatpush1.msra.mxu0 %v638_v58  ;;  %v775_v57 = vld [vmem:[#allocation6 + $0x498] sm:$0xff]  ;;  %v765_v58 = vld [vmem:[#allocation6 + $0x448] sm:$0xff] }
  0x89   : > { %915 = vmatpush1.msra.mxu1 %v628_v59  ;;  %1075 = vmatprep.subr.mxu0 %v631_v60  ;;  %v774_v59 = vld [vmem:[#allocation6 + $0x490] sm:$0xff]  ;;  %v764_v60 = vld [vmem:[#allocation6 + $0x440] sm:$0xff] }
  0x8a   : > { %522 = vmatmul.mubr.f32.gmra.mxu0 %v268_v49  ;;  %916 = vmatprep.subr.mxu1 %v877_v61  ;;  %v791_v49 = vld [vmem:[#allocation6 + $0x518] sm:$0xff] }
  0x8b   : > { %527 = vmatprep.mubr.f32.mxu0 %v2080_v0  ;;  %1076 = vmatpush1.msra.mxu0 %v630_v62  ;;  %v767_v61 = vld [vmem:[#allocation6 + $0x458] sm:$0xff]  ;;  %v757_v62 = vld [vmem:[#allocation6 + $0x408] sm:$0xff] }
  0x8c   : > { %917 = vmatpush2.msra.mxu1 %v876_v1  ;;  %1077 = vmatprep.subr.mxu0 %v879_v2  ;;  %v756_v1 = vld [vmem:[#allocation6 + $0x400] sm:$0xff]  ;;  %v759_v2 = vld [vmem:[#allocation6 + $0x418] sm:$0xff] }
  0x8d   : > { %918 = vmatprep.subr.mxu1 %v869_v3  ;;  %1078 = vmatpush2.msra.mxu0 %v878_v4  ;;  %v753_v3 = vld [vmem:[#allocation6 + $0x3e8] sm:$0xff]  ;;  %v758_v4 = vld [vmem:[#allocation6 + $0x410] sm:$0xff] }
  0x8e   : > { %528 = vmatmul.mubr.f32.gmra.mxu0 %v269_v56  ;;  %919 = vmatpush2.msra.mxu1 %v868_v5  ;;  %v772_v56 = vld [vmem:[#allocation6 + $0x480] sm:$0xff]  ;;  %v2383_v5 = vld [vmem:[#allocation6 + $0x3f8] sm:$0xff] }
  0x8f   : > { %533 = vmatprep.mubr.f32.mxu0 %v2080_v0  ;;  %1079 = vmatprep.subr.mxu0 %v871_v6 }
  0x90   : > { %920 = vmatprep.subr.mxu1 %v861_v8  ;;  %1080 = vmatpush2.msra.mxu0 %v870_v9 }
  0x91   : > { %921 = vmatpush2.msra.mxu1 %v860_v10  ;;  %1081 = vmatprep.subr.mxu0 %v863_v11 }
  0x92   : > { %534 = vmatmul.mubr.f32.gmra.mxu0 %v270_v63  ;;  %922 = vmatprep.subr.mxu1 %v853_v12  ;;  %v766_v63 = vld [vmem:[#allocation6 + $0x450] sm:$0xff]  ;;  %v752_v12 = vld [vmem:[#allocation6 + $0x3e0] sm:$0xff] }
  0x93   : > { %539 = vmatprep.mubr.f32.mxu0 %v2080_v0  ;;  %1082 = vmatpush2.msra.mxu0 %v862_v13  ;;  %v2390_v13 = vld [vmem:[#allocation6 + $0x3f0] sm:$0xff] }
  0x94   : > { %923 = vmatpush2.msra.mxu1 %v852_v15  ;;  %1083 = vmatprep.subr.mxu0 %v855_v16  ;;  %v2394_v15 = vld [vmem:[#allocation6 + $0x3b8] sm:$0xff] }
  0x95   : > { %924 = vmatprep.subr.mxu1 %v845_v17  ;;  %1084 = vmatpush2.msra.mxu0 %v854_v18  ;;  %v744_v18 = vld [vmem:[#allocation6 + $0x3a0] sm:$0xff] }
  0x96   : > { %540 = vmatmul.mubr.f32.gmra.mxu0 %v271_v7  ;;  %925 = vmatpush2.msra.mxu1 %v844_v19 }
  0x97   : > { %545 = vmatprep.mubr.f32.mxu0 %v2080_v0  ;;  %1085 = vmatprep.subr.mxu0 %v847_v20  ;;  %v737_v20 = vld [vmem:[#allocation6 + $0x368] sm:$0xff] }
  0x98   : > { %926 = vmatprep.subr.mxu1 %v837_v22  ;;  %1086 = vmatpush2.msra.mxu0 %v846_v23  ;;  %v2402_v22 = vld [vmem:[#allocation6 + $0x3b0] sm:$0xff] }
  0x99   : > { %927 = vmatpush2.msra.mxu1 %v836_v24  ;;  %1087 = vmatprep.subr.mxu0 %v839_v25  ;;  %v736_v24 = vld [vmem:[#allocation6 + $0x360] sm:$0xff] }
  0x9a   : > { %546 = vmatmul.mubr.f32.gmra.mxu0 %v272_v14  ;;  %928 = vmatprep.subr.mxu1 %v829_v26  ;;  %v745_v14 = vld [vmem:[#allocation6 + $0x3a8] sm:$0xff] }
  0x9b   : > { %551 = vmatprep.mubr.f32.mxu0 %v2080_v0  ;;  %1088 = vmatpush2.msra.mxu0 %v838_v27  ;;  %v2408_v27 = vld [vmem:[#allocation6 + $0x378] sm:$0xff] }
  0x9c   : > { %929 = vmatpush2.msra.mxu1 %v828_v29  ;;  %1089 = vmatprep.subr.mxu0 %v831_v30  ;;  %v2414_v30 = vld [vmem:[#allocation6 + $0x370] sm:$0xff] }
  0x9d   : > { %930 = vmatprep.subr.mxu1 %v821_v31  ;;  %1090 = vmatpush2.msra.mxu0 %v830_v32  ;;  %v728_v31 = vld [vmem:[#allocation6 + $0x320] sm:$0xff] }
  0x9e   : > { %552 = vmatmul.mubr.f32.gmra.mxu0 %v273_v21  ;;  %931 = vmatpush2.msra.mxu1 %v820_v33  ;;  %v2417_v33 = vld [vmem:[#allocation6 + $0x338] sm:$0xff] }
  0x9f   : > { %557 = vmatprep.mubr.f32.mxu0 %v2080_v0  ;;  %v822_v0 = vld [vmem:[#allocation6 + $0x610] sm:$0xff]  ;;  %1091 = vmatprep.subr.mxu0 %v823_v34  ;;  %v721_v34 = vld [vmem:[#allocation6 + $0x2e8] sm:$0xff] }
  0xa0   : > { %932 = vmatprep.subr.mxu1 %v813_v35  ;;  %1092 = vmatpush2.msra.mxu0 %v822_v0  ;;  %v2421_v35 = vld [vmem:[#allocation6 + $0x330] sm:$0xff] }
  0xa1   : > { %933 = vmatpush2.msra.mxu1 %v812_v36  ;;  %1093 = vmatprep.subr.mxu0 %v815_v37  ;;  %v720_v37 = vld [vmem:[#allocation6 + $0x2e0] sm:$0xff] }
  0xa2   : > { %558 = vmatmul.mubr.f32.gmra.mxu0 %v274_v28  ;;  %934 = vmatprep.subr.mxu1 %v805_v38  ;;  %v729_v28 = vld [vmem:[#allocation6 + $0x328] sm:$0xff] }
  0xa3   : > { %1094 = vmatpush2.msra.mxu0 %v814_v39  ;;  %935 = vmatpush2.msra.mxu1 %v804_v40  ;;  %v2428_v39 = vld [vmem:[#allocation6 + $0x2f8] sm:$0xff]  ;;  %v713_v40 = vld [vmem:[#allocation6 + $0x2a8] sm:$0xff] }
  0xa4   : > { %1095 = vmatprep.subr.mxu0 %v807_v41  ;;  %936 = vmatprep.subr.mxu1 %v797_v42 }
  0xa5   : > { %1096 = vmatpush2.msra.mxu0 %v806_v43  ;;  %937 = vmatpush2.msra.mxu1 %v796_v44  ;;  %v2434_v43 = vld [vmem:[#allocation6 + $0x2f0] sm:$0xff]  ;;  %v712_v44 = vld [vmem:[#allocation6 + $0x2a0] sm:$0xff] }
  0xa6   : > { %1097 = vmatprep.subr.mxu0 %v799_v45  ;;  %938 = vmatprep.subr.mxu1 %v789_v46  ;;  %v2437_v45 = vld [vmem:[#allocation6 + $0x2b8] sm:$0xff] }
  0xa7   : > { %1098 = vmatpush2.msra.mxu0 %v798_v47  ;;  %939 = vmatpush2.msra.mxu1 %v788_v48  ;;  %v705_v47 = vld [vmem:[#allocation6 + $0x268] sm:$0xff]  ;;  %v2441_v48 = vld [vmem:[#allocation6 + $0x2b0] sm:$0xff] }
  0xa8   : > { %1099 = vmatprep.subr.mxu0 %v791_v49  ;;  %940 = vmatprep.subr.mxu1 %v781_v50 }
  0xa9   : > { %1100 = vmatpush2.msra.mxu0 %v790_v51  ;;  %941 = vmatpush2.msra.mxu1 %v780_v52  ;;  %v704_v51 = vld [vmem:[#allocation6 + $0x260] sm:$0xff] }
  0xaa   : > { %1101 = vmatprep.subr.mxu0 %v783_v53  ;;  %942 = vmatprep.subr.mxu1 %v773_v54  ;;  %v2448_v53 = vld [vmem:[#allocation6 + $0x278] sm:$0xff]  ;;  %v697_v54 = vld [vmem:[#allocation6 + $0x228] sm:$0xff] }
  0xab   : > { %1102 = vmatpush2.msra.mxu0 %v782_v55  ;;  %943 = vmatpush2.msra.mxu1 %v772_v56 }
  0xac   : > { %1103 = vmatprep.subr.mxu0 %v775_v57  ;;  %944 = vmatprep.subr.mxu1 %v765_v58  ;;  %v2454_v57 = vld [vmem:[#allocation6 + $0x270] sm:$0xff]  ;;  %v696_v58 = vld [vmem:[#allocation6 + $0x220] sm:$0xff] }
  0xad   : > { %1104 = vmatpush2.msra.mxu0 %v774_v59  ;;  %945 = vmatpush2.msra.mxu1 %v764_v60  ;;  %v2457_v59 = vld [vmem:[#allocation6 + $0x238] sm:$0xff] }
  0xae   : > { %1105 = vmatprep.subr.mxu0 %v767_v61  ;;  %946 = vmatprep.subr.mxu1 %v757_v62  ;;  %v689_v61 = vld [vmem:[#allocation6 + $0x1e8] sm:$0xff]  ;;  %v2461_v62 = vld [vmem:[#allocation6 + $0x230] sm:$0xff] }
  0xaf   : > { %1106 = vmatpush2.msra.mxu0 %v766_v63  ;;  %947 = vmatpush2.msra.mxu1 %v756_v1 }
  0xb0   : > { %1107 = vmatprep.subr.mxu0 %v759_v2  ;;  %1206 = vmatprep.subr.mxu1 %v753_v3  ;;  %v688_v2 = vld [vmem:[#allocation6 + $0x1e0] sm:$0xff] }
  0xb1   : > { %1108 = vmatpush2.msra.mxu0 %v758_v4  ;;  %v2468_v4 = vld [vmem:[#allocation6 + $0x1f8] sm:$0xff] }
  0xb2   : > { %1367 = vmatprep.subr.mxu0 %v2383_v5 }
  0xc6   : > { %v326_v6 = vpop.permute.xlu0 %325 }
  0xc7   : > { %v336_v25 = vpop.permute.xlu1 %335 }
  0xca   : > { %v331_v16 = vpop.permute.xlu0 %330 }
  0xcb   : > { %v341_v38 = vpop.permute.xlu1 %340 }
  0xce   : > { %v346_v52 = vpop.permute.xlu0 %345 }
  0xcf   : > { %v351_v3 = vpop.permute.xlu1 %350 }
 0x126   : > { %v469_v7 = vpop.f32.mrf.mxu0 }
 0x127   : > { %v2388_v10 = vadd.f32 %v469_v7, %v326_v6 }
 0x128   : > { %v471_v8 = vpop.f32.mrf.mxu0 }
 0x129   : > { %v2386_v9 = vadd.f32 %v471_v8, %v326_v6  ;;  %v681_v6 = vld [vmem:[#allocation6 + $0x1a8] sm:$0xff] }
 0x12a   : > { %v475_v11 = vpop.f32.mrf.mxu0 }
 0x12b   : > { %948 = vmatprep.mubr.f32.mxu1 %v2386_v9  ;;  %1109 = vmatprep.mubr.f32.mxu0 %v2386_v9  ;;  %v2404_v23 = vadd.f32 %v475_v11, %v331_v16  ;;  %v2476_v11 = vld [vmem:[#allocation6 + $0x1f0] sm:$0xff] }
 0x12c   : > { %v477_v17 = vpop.f32.mrf.mxu0  ;;  %949 = vmatmul.mubr.f32.vlgmr.msra.gmra.mxu1 %v2388_v10  ;;  %1110 = vmatmul.mubr.f32.vlgmr.msra.gmra.mxu0 %v2388_v10 }
 0x12d   : > { %v2398_v19 = vadd.f32 %v477_v17, %v331_v16  ;;  %1207 = vmatpush1.msra.mxu1 %v752_v12  ;;  %1368 = vmatpush1.msra.mxu0 %v2390_v13  ;;  %v680_v12 = vld [vmem:[#allocation6 + $0x1a0] sm:$0xff]  ;;  %v673_v17 = vld [vmem:[#allocation6 + $0x168] sm:$0xff] }
 0x12e   : > { %1208 = vmatprep.subr.mxu1 %v745_v14  ;;  %v481_v21 = vpop.f32.mrf.mxu0  ;;  %1369 = vmatprep.subr.mxu0 %v2394_v15  ;;  %v2479_v14 = vld [vmem:[#allocation6 + $0x1b8] sm:$0xff] }
 0x12f   : > { %1209 = vmatpush1.msra.mxu1 %v744_v18  ;;  %954 = vmatprep.mubr.f32.mxu1 %v2398_v19  ;;  %v2423_v36 = vadd.f32 %v481_v21, %v336_v25  ;;  %v2483_v18 = vld [vmem:[#allocation6 + $0x1b0] sm:$0xff] }
 0x130   : > { %1115 = vmatprep.mubr.f32.mxu0 %v2398_v19  ;;  %1210 = vmatprep.subr.mxu1 %v737_v20  ;;  %v483_v26 = vpop.f32.mrf.mxu0 }
 0x131   : > { %1370 = vmatpush1.msra.mxu0 %v2402_v22  ;;  %v2411_v29 = vadd.f32 %v483_v26, %v336_v25  ;;  %955 = vmatmul.mubr.f32.gmra.mxu1 %v2404_v23  ;;  %v356_v25 = vpop.permute.xlu0 %355  ;;  %v2492_v26 = vld [vmem:[#allocation6 + $0x178] sm:$0xff] }
 0x132   : > { %1116 = vmatmul.mubr.f32.gmra.mxu0 %v2404_v23  ;;  %1211 = vmatpush1.msra.mxu1 %v736_v24  ;;  %v487_v32 = vpop.f32.mrf.mxu0  ;;  %v672_v24 = vld [vmem:[#allocation6 + $0x160] sm:$0xff] }
 0x133   : > { %1371 = vmatprep.subr.mxu0 %v2408_v27  ;;  %1212 = vmatprep.subr.mxu1 %v729_v28  ;;  %v2443_v50 = vadd.f32 %v487_v32, %v341_v38  ;;  %v665_v28 = vld [vmem:[#allocation6 + $0x128] sm:$0xff] }
 0x134   : > { %1372 = vmatpush1.msra.mxu0 %v2414_v30  ;;  %1213 = vmatpush1.msra.mxu1 %v728_v31  ;;  %v489_v0 = vpop.f32.mrf.mxu0 }
 0x135   : > { %1373 = vmatprep.subr.mxu0 %v2417_v33  ;;  %960 = vmatprep.mubr.f32.mxu1 %v2411_v29  ;;  %v2431_v42 = vadd.f32 %v489_v0, %v341_v38  ;;  %v664_v0 = vld [vmem:[#allocation6 + $0x120] sm:$0xff] }
 0x136   : > { %1121 = vmatprep.mubr.f32.mxu0 %v2411_v29  ;;  %1214 = vmatprep.subr.mxu1 %v721_v34  ;;  %v493_v41 = vpop.f32.mrf.mxu0  ;;  %v2498_v34 = vld [vmem:[#allocation6 + $0x170] sm:$0xff] }
 0x137   : > { %1374 = vmatpush1.msra.mxu0 %v2421_v35  ;;  %961 = vmatmul.mubr.f32.gmra.mxu1 %v2423_v36  ;;  %v2463_v1 = vadd.f32 %v493_v41, %v346_v52  ;;  %v2507_v41 = vld [vmem:[#allocation6 + $0x130] sm:$0xff] }
 0x138   : > { %1122 = vmatmul.mubr.f32.gmra.mxu0 %v2423_v36  ;;  %1215 = vmatpush1.msra.mxu1 %v720_v37  ;;  %v495_v46 = vpop.f32.mrf.mxu0  ;;  %v2501_v37 = vld [vmem:[#allocation6 + $0x138] sm:$0xff] }
 0x139   : > { %1375 = vmatprep.subr.mxu0 %v2428_v39  ;;  %1216 = vmatprep.subr.mxu1 %v713_v40  ;;  %v2451_v56 = vadd.f32 %v495_v46, %v346_v52  ;;  %v657_v40 = vld [vmem:[#allocation6 + $0xe8] sm:$0xff] }
 0x13a   : > { %1376 = vmatpush1.msra.mxu0 %v2434_v43  ;;  %1217 = vmatpush1.msra.mxu1 %v712_v44  ;;  %v499_v49 = vpop.f32.mrf.mxu0  ;;  %v649_v52 = vld [vmem:[#allocation6 + $0xa8] sm:$0xff] }
 0x13b   : > { %1377 = vmatprep.subr.mxu0 %v2437_v45  ;;  %966 = vmatprep.mubr.f32.mxu1 %v2431_v42  ;;  %v2487_v21 = vadd.f32 %v499_v49, %v351_v3  ;;  %v361_v49 = vpop.permute.xlu1 %360 }
 0x13c   : > { %1127 = vmatprep.mubr.f32.mxu0 %v2431_v42  ;;  %1218 = vmatprep.subr.mxu1 %v705_v47  ;;  %v501_v55 = vpop.f32.mrf.mxu0  ;;  %v656_v47 = vld [vmem:[#allocation6 + $0xe0] sm:$0xff] }
 0x13d   : > { %1378 = vmatpush1.msra.mxu0 %v2441_v48  ;;  %967 = vmatmul.mubr.f32.gmra.mxu1 %v2443_v50  ;;  %v2473_v8 = vadd.f32 %v501_v55, %v351_v3  ;;  %v2520_v55 = vld [vmem:[#allocation6 + $0xf0] sm:$0xff] }
 0x13e   : > { %1128 = vmatmul.mubr.f32.gmra.mxu0 %v2443_v50  ;;  %1219 = vmatpush1.msra.mxu1 %v704_v51  ;;  %v505_v60 = vpop.f32.mrf.mxu0  ;;  %v2514_v51 = vld [vmem:[#allocation6 + $0xf8] sm:$0xff] }
 0x13f   : > { %1379 = vmatprep.subr.mxu0 %v2448_v53  ;;  %1220 = vmatprep.subr.mxu1 %v697_v54  ;;  %v2509_v46 = vadd.f32 %v505_v60, %v356_v25  ;;  %v2523_v60 = vld [vmem:[#allocation6 + $0xb8] sm:$0xff] }
 0x140   : > { %1380 = vmatpush1.msra.mxu0 %v2454_v57  ;;  %1221 = vmatpush1.msra.mxu1 %v696_v58  ;;  %v507_v63 = vpop.f32.mrf.mxu0  ;;  %v648_v58 = vld [vmem:[#allocation6 + $0xa0] sm:$0xff] }
 0x141   : > { %1381 = vmatprep.subr.mxu0 %v2457_v59  ;;  %972 = vmatprep.mubr.f32.mxu1 %v2451_v56  ;;  %v2495_v32 = vadd.f32 %v507_v63, %v356_v25  ;;  %v641_v63 = vld [vmem:[#allocation6 + $0x68] sm:$0xff] }
 0x142   : > { %1133 = vmatprep.mubr.f32.mxu0 %v2451_v56  ;;  %1222 = vmatprep.subr.mxu1 %v689_v61  ;;  %v2470_v7 = vpop.f32.mrf.mxu0 }
 0x143   : > { %1382 = vmatpush1.msra.mxu0 %v2461_v62  ;;  %973 = vmatmul.mubr.f32.gmra.mxu1 %v2463_v1  ;;  %v2532_v3 = vadd.f32 %v2470_v7, %v361_v49  ;;  %v2543_v7 = vld [vmem:[#allocation6 + $0x70] sm:$0xff] }
 0x144   : > { %1134 = vmatmul.mubr.f32.gmra.mxu0 %v2463_v1  ;;  %1223 = vmatpush1.msra.mxu1 %v688_v2  ;;  %v513_v16 = vpop.f32.mrf.mxu0  ;;  %v2529_v2 = vld [vmem:[#allocation6 + $0xb0] sm:$0xff] }
 0x145   : > { %1383 = vmatprep.subr.mxu0 %v2468_v4  ;;  %1224 = vmatprep.subr.mxu1 %v681_v6  ;;  %v2517_v54 = vadd.f32 %v513_v16, %v361_v49  ;;  %v640_v6 = vld [vmem:[#allocation6 + $0x60] sm:$0xff]  ;;  %v2537_v16 = vld [vmem:[#allocation6 + $0x78] sm:$0xff] }
 0x146   : > { %1384 = vmatpush1.msra.mxu0 %v2476_v11  ;;  %1225 = vmatpush1.msra.mxu1 %v680_v12  ;;  %v2485_v20 = vpop.f32.mrf.mxu0  ;;  %v366_v12 = vpop.permute.xlu0 %365 }
 0x147   : > { %1385 = vmatprep.subr.mxu0 %v2479_v14  ;;  %978 = vmatprep.mubr.f32.mxu1 %v2473_v8  ;;  %v2555_v49 = vadd.f32 %v2485_v20, %v366_v12  ;;  %v2566_v20 = vld [vmem:[#allocation6 + $0x7f0] sm:$0xff] }
 0x148   : > { %1139 = vmatprep.mubr.f32.mxu0 %v2473_v8  ;;  %1226 = vmatprep.subr.mxu1 %v673_v17  ;;  %v519_v31 = vpop.f32.mrf.mxu0  ;;  %v633_v17 = vld [vmem:[#allocation6 + $0x28] sm:$0xff] }
 0x149   : > { %1386 = vmatpush1.msra.mxu0 %v2483_v18  ;;  %979 = vmatmul.mubr.f32.gmra.mxu1 %v2487_v21  ;;  %v2540_v25 = vadd.f32 %v519_v31, %v366_v12  ;;  %3106 = vst [vmem:[#allocation15_spill] sm:$0xff] %v2555_v49  ;;  %v872_v12 = vld [vmem:[#allocation6 + $0x7a0] sm:$0xff] }
 0x14a   : > { %1140 = vmatmul.mubr.f32.gmra.mxu0 %v2487_v21  ;;  %1227 = vmatpush1.msra.mxu1 %v672_v24  ;;  %v2503_v38 = vpop.f32.mrf.mxu0 }
 0x14b   : > { %1387 = vmatprep.subr.mxu0 %v2492_v26  ;;  %1228 = vmatprep.subr.mxu1 %v665_v28  ;;  %3103 = vst [vmem:[#allocation12_spill] sm:$0xff] %v2540_v25  ;;  %v632_v28 = vld [vmem:[#allocation6 + $0x20] sm:$0xff] }
 0x14c   : > { %1388 = vmatpush1.msra.mxu0 %v2498_v34  ;;  %1229 = vmatpush1.msra.mxu1 %v664_v0  ;;  %v525_v44 = vpop.f32.mrf.mxu0  ;;  %v2546_v0 = vld [vmem:[#allocation6 + $0x38] sm:$0xff] }
 0x14d   : > { %1389 = vmatprep.subr.mxu0 %v2501_v37  ;;  %984 = vmatprep.mubr.f32.mxu1 %v2495_v32  ;;  %3104 = vst [vmem:[#allocation13_spill] sm:$0xff] %v2546_v0 }
 0x14e   : > { %1145 = vmatprep.mubr.f32.mxu0 %v2495_v32  ;;  %1230 = vmatprep.subr.mxu1 %v657_v40  ;;  %v2525_v61 = vpop.f32.mrf.mxu0  ;;  %v881_v40 = vld [vmem:[#allocation6 + $0x7e8] sm:$0xff] }
 0x14f   : > { %1390 = vmatpush1.msra.mxu0 %v2507_v41  ;;  %985 = vmatmul.mubr.f32.gmra.mxu1 %v2509_v46 }
 0x150   : > { %1146 = vmatmul.mubr.f32.gmra.mxu0 %v2509_v46  ;;  %1231 = vmatpush1.msra.mxu1 %v656_v47  ;;  %v531_v24 = vpop.f32.mrf.mxu0  ;;  %v2550_v47 = vld [vmem:[#allocation6 + $0x30] sm:$0xff] }
 0x151   : > { %1391 = vmatprep.subr.mxu0 %v2514_v51  ;;  %1232 = vmatprep.subr.mxu1 %v649_v52  ;;  %3105 = vst [vmem:[#allocation14_spill] sm:$0xff] %v2550_v47  ;;  %v880_v52 = vld [vmem:[#allocation6 + $0x7e0] sm:$0xff] }
 0x152   : > { %1392 = vmatpush1.msra.mxu0 %v2520_v55  ;;  %1233 = vmatpush1.msra.mxu1 %v648_v58  ;;  %v2552_v31 = vpop.f32.mrf.mxu0  ;;  %v371_v58 = vpop.permute.xlu1 %370 }
 0x153   : > { %1393 = vmatprep.subr.mxu0 %v2523_v60  ;;  %990 = vmatprep.mubr.f32.mxu1 %v2517_v54 }
 0x154   : > { %1151 = vmatprep.mubr.f32.mxu0 %v2517_v54  ;;  %1234 = vmatprep.subr.mxu1 %v641_v63  ;;  %v2560_v63 = vld [vmem:[#allocation6 + $0x7f8] sm:$0xff] }
 0x155   : > { %1394 = vmatpush1.msra.mxu0 %v2529_v2  ;;  %991 = vmatmul.mubr.f32.gmra.mxu1 %v2532_v3  ;;  %3107 = vst [vmem:[#allocation16_spill] sm:$0xff] %v2560_v63 }
 0x156   : > { %1152 = vmatmul.mubr.f32.gmra.mxu0 %v2532_v3  ;;  %1235 = vmatpush1.msra.mxu1 %v640_v6  ;;  %v873_v6 = vld [vmem:[#allocation6 + $0x7a8] sm:$0xff] }
 0x157   : > { %1395 = vmatprep.subr.mxu0 %v2537_v16  ;;  %1236 = vmatprep.subr.mxu1 %v633_v17  ;;  %v2563_v17 = vadd.f32 %v525_v44, %v371_v58  ;;  %v2573_v44 = vld [vmem:[#allocation6 + $0x7b0] sm:$0xff] }
 0x158   : > { %1396 = vmatpush1.msra.mxu0 %v2543_v7  ;;  %1237 = vmatpush1.msra.mxu1 %v632_v28  ;;  %v2569_v28 = vld [vmem:[#allocation6 + $0x7b8] sm:$0xff]  ;;  %3110 = vst [vmem:[#allocation19_spill] sm:$0xff] %v2573_v44 }
 0x159   : > { %1397 = vmatprep.subr.mxu0 %v2546_v0  ;;  %996 = vmatprep.mubr.f32.mxu1 %v2540_v25  ;;  %3108 = vst [vmem:[#allocation17_spill] sm:$0xff] %v2563_v17  ;;  %3109 = vst [vmem:[#allocation18_spill] sm:$0xff] %v2569_v28  ;;  %v537_v0 = vpop.f32.mrf.mxu0 }
 0x15a   : > { %1157 = vmatprep.mubr.f32.mxu0 %v2540_v25  ;;  %1238 = vmatprep.subr.mxu1 %v881_v40  ;;  %v865_v40 = vld [vmem:[#allocation6 + $0x768] sm:$0xff] }
 0x15b   : > { %1398 = vmatpush1.msra.mxu0 %v2550_v47  ;;  %997 = vmatmul.mubr.f32.gmra.mxu1 %v2555_v49  ;;  %v2576_v47 = vadd.f32 %v2503_v38, %v371_v58  ;;  %v2583_v25 = vpop.f32.mrf.mxu0  ;;  %v2589_v38 = vld [vmem:[#allocation6 + $0x770] sm:$0xff]  ;;  %v856_v58 = vld [vmem:[#allocation6 + $0x720] sm:$0xff] }
 0x15c   : > { %1158 = vmatmul.mubr.f32.gmra.mxu0 %v2555_v49  ;;  %1239 = vmatpush2.msra.mxu1 %v880_v52  ;;  %v864_v52 = vld [vmem:[#allocation6 + $0x760] sm:$0xff]  ;;  %v376_v49 = vpop.permute.xlu0 %375  ;;  %3114 = vst [vmem:[#allocation23_spill] sm:$0xff] %v2589_v38 }
 0x15d   : > { %1399 = vmatprep.subr.mxu0 %v2560_v63  ;;  %1240 = vmatprep.subr.mxu1 %v873_v6  ;;  %3111 = vst [vmem:[#allocation20_spill] sm:$0xff] %v2576_v47  ;;  %v2581_v63 = vld [vmem:[#allocation6 + $0x778] sm:$0xff]  ;;  %v857_v6 = vld [vmem:[#allocation6 + $0x728] sm:$0xff] }
 0x15e   : > { %1400 = vmatpush2.msra.mxu0 %v2566_v20  ;;  %1241 = vmatpush2.msra.mxu1 %v872_v12  ;;  %3112 = vst [vmem:[#allocation21_spill] sm:$0xff] %v2581_v63  ;;  %v2586_v12 = vadd.f32 %v531_v24, %v376_v49  ;;  %v543_v24 = vpop.f32.mrf.mxu0 }
 0x15f   : > { %1401 = vmatprep.subr.mxu0 %v2569_v28  ;;  %1002 = vmatprep.mubr.f32.mxu1 %v2563_v17  ;;  %v2592_v28 = vld [vmem:[#allocation6 + $0x738] sm:$0xff] }
 0x160   : > { %1163 = vmatprep.mubr.f32.mxu0 %v2563_v17  ;;  %1242 = vmatprep.subr.mxu1 %v865_v40  ;;  %3113 = vst [vmem:[#allocation22_spill] sm:$0xff] %v2586_v12  ;;  %3115 = vst [vmem:[#allocation24_spill] sm:$0xff] %v2592_v28  ;;  %v849_v40 = vld [vmem:[#allocation6 + $0x6e8] sm:$0xff]  ;;  %v2599_v17 = vadd.f32 %v2525_v61, %v376_v49  ;;  %v2610_v61 = vld [vmem:[#allocation6 + $0x6f0] sm:$0xff] }
 0x161   : > { %1402 = vmatpush2.msra.mxu0 %v2573_v44  ;;  %1003 = vmatmul.mubr.f32.gmra.mxu1 %v2576_v47  ;;  %v2596_v44 = vld [vmem:[#allocation6 + $0x730] sm:$0xff]  ;;  %v840_v49 = vld [vmem:[#allocation6 + $0x6a0] sm:$0xff] }
 0x162   : > { %1164 = vmatmul.mubr.f32.gmra.mxu0 %v2576_v47  ;;  %1243 = vmatpush2.msra.mxu1 %v864_v52  ;;  %3116 = vst [vmem:[#allocation25_spill] sm:$0xff] %v2596_v44  ;;  %3117 = vst [vmem:[#allocation26_spill] sm:$0xff] %v2599_v17  ;;  %v848_v52 = vld [vmem:[#allocation6 + $0x6e0] sm:$0xff]  ;;  %v381_v47 = vpop.permute.xlu1 %380 }
 0x163   : > { %1403 = vmatprep.subr.mxu0 %v2581_v63  ;;  %1244 = vmatprep.subr.mxu1 %v857_v6  ;;  %v2604_v6 = vld [vmem:[#allocation6 + $0x6f8] sm:$0xff]  ;;  %v841_v63 = vld [vmem:[#allocation6 + $0x6a8] sm:$0xff] }
 0x164   : > { %1404 = vmatpush2.msra.mxu0 %v2589_v38  ;;  %1245 = vmatpush2.msra.mxu1 %v856_v58  ;;  %3118 = vst [vmem:[#allocation27_spill] sm:$0xff] %v2604_v6  ;;  %v2607_v58 = vadd.f32 %v537_v0, %v381_v47  ;;  %v547_v38 = vpop.f32.mrf.mxu0  ;;  %v2617_v0 = vld [vmem:[#allocation6 + $0x6b0] sm:$0xff] }
 0x165   : > { %1405 = vmatprep.subr.mxu0 %v2592_v28  ;;  %1008 = vmatprep.mubr.f32.mxu1 %v2586_v12  ;;  %v2613_v28 = vld [vmem:[#allocation6 + $0x6b8] sm:$0xff]  ;;  %3121 = vst [vmem:[#allocation30_spill] sm:$0xff] %v2617_v0 }
 0x166   : > { %1169 = vmatprep.mubr.f32.mxu0 %v2586_v12  ;;  %1246 = vmatprep.subr.mxu1 %v849_v40  ;;  %3119 = vst [vmem:[#allocation28_spill] sm:$0xff] %v2607_v58  ;;  %3120 = vst [vmem:[#allocation29_spill] sm:$0xff] %v2613_v28  ;;  %v833_v40 = vld [vmem:[#allocation6 + $0x668] sm:$0xff]  ;;  %v549_v12 = vpop.f32.mrf.mxu0 }
 0x167   : > { %1406 = vmatpush2.msra.mxu0 %v2596_v44  ;;  %1009 = vmatmul.mubr.f32.gmra.mxu1 %v2599_v17  ;;  %v2620_v44 = vadd.f32 %v2552_v31, %v381_v47  ;;  %v2631_v47 = vld [vmem:[#allocation6 + $0x670] sm:$0xff]  ;;  %v824_v31 = vld [vmem:[#allocation6 + $0x620] sm:$0xff] }
 0x168   : > { %1170 = vmatmul.mubr.f32.gmra.mxu0 %v2599_v17  ;;  %1247 = vmatpush2.msra.mxu1 %v848_v52  ;;  %v832_v52 = vld [vmem:[#allocation6 + $0x660] sm:$0xff]  ;;  %v386_v17 = vpop.permute.xlu0 %385  ;;  %3125 = vst [vmem:[#allocation34_spill] sm:$0xff] %v2631_v47 }
 0x169   : > { %1407 = vmatprep.subr.mxu0 %v2604_v6  ;;  %1248 = vmatprep.subr.mxu1 %v841_v63  ;;  %3122 = vst [vmem:[#allocation31_spill] sm:$0xff] %v2620_v44  ;;  %v2625_v6 = vld [vmem:[#allocation6 + $0x678] sm:$0xff]  ;;  %v825_v63 = vld [vmem:[#allocation6 + $0x628] sm:$0xff] }
 0x16a   : > { %1408 = vmatpush2.msra.mxu0 %v2610_v61  ;;  %1249 = vmatpush2.msra.mxu1 %v840_v49  ;;  %3123 = vst [vmem:[#allocation32_spill] sm:$0xff] %v2625_v6  ;;  %v2628_v49 = vadd.f32 %v543_v24, %v386_v17  ;;  %v553_v24 = vpop.f32.mrf.mxu0 }
 0x16b   : > { %1409 = vmatprep.subr.mxu0 %v2613_v28  ;;  %1014 = vmatprep.mubr.f32.mxu1 %v2607_v58  ;;  %v2634_v28 = vld [vmem:[#allocation6 + $0x638] sm:$0xff] }
 0x16c   : > { %1175 = vmatprep.mubr.f32.mxu0 %v2607_v58  ;;  %1250 = vmatprep.subr.mxu1 %v833_v40  ;;  %3124 = vst [vmem:[#allocation33_spill] sm:$0xff] %v2628_v49  ;;  %3126 = vst [vmem:[#allocation35_spill] sm:$0xff] %v2634_v28  ;;  %v817_v40 = vld [vmem:[#allocation6 + $0x5e8] sm:$0xff]  ;;  %v2641_v58 = vadd.f32 %v2583_v25, %v386_v17  ;;  %v2652_v25 = vld [vmem:[#allocation6 + $0x5f0] sm:$0xff] }
 0x16d   : > { %1410 = vmatpush2.msra.mxu0 %v2617_v0  ;;  %1015 = vmatmul.mubr.f32.gmra.mxu1 %v2620_v44  ;;  %v2638_v0 = vld [vmem:[#allocation6 + $0x630] sm:$0xff]  ;;  %v808_v17 = vld [vmem:[#allocation6 + $0x5a0] sm:$0xff] }
 0x16e   : > { %1176 = vmatmul.mubr.f32.gmra.mxu0 %v2620_v44  ;;  %1251 = vmatpush2.msra.mxu1 %v832_v52  ;;  %3127 = vst [vmem:[#allocation36_spill] sm:$0xff] %v2638_v0  ;;  %3128 = vst [vmem:[#allocation37_spill] sm:$0xff] %v2641_v58  ;;  %v816_v52 = vld [vmem:[#allocation6 + $0x5e0] sm:$0xff]  ;;  %v391_v44 = vpop.permute.xlu1 %390 }
 0x16f   : > { %1411 = vmatprep.subr.mxu0 %v2625_v6  ;;  %1252 = vmatprep.subr.mxu1 %v825_v63  ;;  %v2646_v63 = vld [vmem:[#allocation6 + $0x5f8] sm:$0xff]  ;;  %v809_v6 = vld [vmem:[#allocation6 + $0x5a8] sm:$0xff] }
 0x170   : > { %1412 = vmatpush2.msra.mxu0 %v2631_v47  ;;  %1253 = vmatpush2.msra.mxu1 %v824_v31  ;;  %3129 = vst [vmem:[#allocation38_spill] sm:$0xff] %v2646_v63  ;;  %v2649_v31 = vadd.f32 %v549_v12, %v391_v44  ;;  %v555_v47 = vpop.f32.mrf.mxu0  ;;  %v2659_v12 = vld [vmem:[#allocation6 + $0x5b0] sm:$0xff] }
 0x171   : > { %1413 = vmatprep.subr.mxu0 %v2634_v28  ;;  %1020 = vmatprep.mubr.f32.mxu1 %v2628_v49  ;;  %v2655_v28 = vld [vmem:[#allocation6 + $0x5b8] sm:$0xff]  ;;  %3132 = vst [vmem:[#allocation41_spill] sm:$0xff] %v2659_v12 }
 0x172   : > { %1181 = vmatprep.mubr.f32.mxu0 %v2628_v49  ;;  %1254 = vmatprep.subr.mxu1 %v817_v40  ;;  %3130 = vst [vmem:[#allocation39_spill] sm:$0xff] %v2649_v31  ;;  %3131 = vst [vmem:[#allocation40_spill] sm:$0xff] %v2655_v28  ;;  %v801_v40 = vld [vmem:[#allocation6 + $0x568] sm:$0xff]  ;;  %v2666_v49 = vld [vmem:[#allocation6 + $0x578] sm:$0xff] }
 0x173   : > { %1414 = vmatpush2.msra.mxu0 %v2638_v0  ;;  %1021 = vmatmul.mubr.f32.gmra.mxu1 %v2641_v58  ;;  %v2661_v0 = vadd.f32 %v547_v38, %v391_v44  ;;  %3134 = vst [vmem:[#allocation43_spill] sm:$0xff] %v2666_v49  ;;  %v2672_v44 = vld [vmem:[#allocation6 + $0x570] sm:$0xff]  ;;  %v792_v38 = vld [vmem:[#allocation6 + $0x520] sm:$0xff] }
 0x174   : > { %1182 = vmatmul.mubr.f32.gmra.mxu0 %v2641_v58  ;;  %1255 = vmatpush2.msra.mxu1 %v816_v52  ;;  %v800_v58 = vld [vmem:[#allocation6 + $0x560] sm:$0xff]  ;;  %v396_v52 = vpop.permute.xlu0 %395 }
 0x175   : > { %1415 = vmatprep.subr.mxu0 %v2646_v63  ;;  %1256 = vmatprep.subr.mxu1 %v809_v6  ;;  %3133 = vst [vmem:[#allocation42_spill] sm:$0xff] %v2661_v0  ;;  %v793_v6 = vld [vmem:[#allocation6 + $0x528] sm:$0xff]  ;;  %v559_v63 = vpop.f32.mrf.mxu0 }
 0x176   : > { %1416 = vmatpush2.msra.mxu0 %v2652_v25  ;;  %1257 = vmatpush2.msra.mxu1 %v808_v17  ;;  %v2669_v17 = vadd.f32 %v555_v47, %v396_v52 }
 0x177   : > { %1417 = vmatprep.subr.mxu0 %v2655_v28  ;;  %1026 = vmatprep.mubr.f32.mxu1 %v2649_v31  ;;  %v2675_v28 = vld [vmem:[#allocation6 + $0x538] sm:$0xff]  ;;  %v561_v47 = vpop.f32.mrf.mxu0 }
 0x178   : > { %1187 = vmatprep.mubr.f32.mxu0 %v2649_v31  ;;  %1258 = vmatprep.subr.mxu1 %v801_v40  ;;  %3135 = vst [vmem:[#allocation44_spill] sm:$0xff] %v2669_v17  ;;  %3136 = vst [vmem:[#allocation45_spill] sm:$0xff] %v2675_v28  ;;  %v785_v40 = vld [vmem:[#allocation6 + $0x4e8] sm:$0xff]  ;;  %v2681_v31 = vadd.f32 %v553_v24, %v396_v52  ;;  %v2692_v24 = vld [vmem:[#allocation6 + $0x4f0] sm:$0xff] }
 0x179   : > { %1418 = vmatpush2.msra.mxu0 %v2659_v12  ;;  %1027 = vmatmul.mubr.f32.gmra.mxu1 %v2661_v0  ;;  %v2679_v12 = vld [vmem:[#allocation6 + $0x530] sm:$0xff]  ;;  %v776_v52 = vld [vmem:[#allocation6 + $0x4a0] sm:$0xff] }
 0x17a   : > { %1188 = vmatmul.mubr.f32.gmra.mxu0 %v2661_v0  ;;  %1259 = vmatpush2.msra.mxu1 %v800_v58  ;;  %3137 = vst [vmem:[#allocation46_spill] sm:$0xff] %v2679_v12  ;;  %3138 = vst [vmem:[#allocation47_spill] sm:$0xff] %v2681_v31  ;;  %v784_v0 = vld [vmem:[#allocation6 + $0x4e0] sm:$0xff]  ;;  %v401_v58 = vpop.permute.xlu1 %400 }
 0x17b   : > { %1419 = vmatprep.subr.mxu0 %v2666_v49  ;;  %1260 = vmatprep.subr.mxu1 %v793_v6  ;;  %v2686_v49 = vld [vmem:[#allocation6 + $0x4f8] sm:$0xff]  ;;  %v777_v6 = vld [vmem:[#allocation6 + $0x4a8] sm:$0xff] }
 0x17c   : > { %1420 = vmatpush2.msra.mxu0 %v2672_v44  ;;  %1261 = vmatpush2.msra.mxu1 %v792_v38  ;;  %v2689_v38 = vadd.f32 %v561_v47, %v401_v58  ;;  %v2701_v47 = vadd.f32 %v559_v63, %v401_v58  ;;  %v760_v63 = vld [vmem:[#allocation6 + $0x420] sm:$0xff]  ;;  %v2714_v58 = vld [vmem:[#allocation6 + $0x438] sm:$0xff] }
 0x17d   : > { %1421 = vmatprep.subr.mxu0 %v2675_v28  ;;  %1032 = vmatprep.mubr.f32.mxu1 %v2669_v17  ;;  %v2695_v28 = vld [vmem:[#allocation6 + $0x4b8] sm:$0xff] }
 0x17e   : > { %1193 = vmatprep.mubr.f32.mxu0 %v2669_v17  ;;  %1262 = vmatprep.subr.mxu1 %v785_v40  ;;  %v769_v40 = vld [vmem:[#allocation6 + $0x468] sm:$0xff]  ;;  %v768_v17 = vld [vmem:[#allocation6 + $0x460] sm:$0xff] }
 0x17f   : > { %1422 = vmatpush2.msra.mxu0 %v2679_v12  ;;  %1033 = vmatmul.mubr.f32.gmra.mxu1 %v2681_v31  ;;  %v2699_v12 = vld [vmem:[#allocation6 + $0x4b0] sm:$0xff] }
 0x180   : > { %1194 = vmatmul.mubr.f32.gmra.mxu0 %v2681_v31  ;;  %1263 = vmatpush2.msra.mxu1 %v784_v0  ;;  %v2706_v0 = vld [vmem:[#allocation6 + $0x478] sm:$0xff]  ;;  %v761_v31 = vld [vmem:[#allocation6 + $0x428] sm:$0xff] }
 0x181   : > { %1423 = vmatprep.subr.mxu0 %v2686_v49  ;;  %1264 = vmatprep.subr.mxu1 %v777_v6  ;;  %v2710_v6 = vld [vmem:[#allocation6 + $0x470] sm:$0xff] }
 0x182   : > { %1424 = vmatpush2.msra.mxu0 %v2692_v24  ;;  %1265 = vmatpush2.msra.mxu1 %v776_v52  ;;  %v2718_v52 = vld [vmem:[#allocation6 + $0x430] sm:$0xff] }
 0x183   : > { %1425 = vmatprep.subr.mxu0 %v2695_v28  ;;  %1038 = vmatprep.mubr.f32.mxu1 %v2689_v38 }
 0x184   : > { %1199 = vmatprep.mubr.f32.mxu0 %v2689_v38  ;;  %1266 = vmatprep.subr.mxu1 %v769_v40 }
 0x185   : > { %1426 = vmatpush2.msra.mxu0 %v2699_v12  ;;  %1039 = vmatmul.mubr.f32.gmra.mxu1 %v2701_v47 }
 0x186   : > { %1200 = vmatmul.mubr.f32.gmra.mxu0 %v2701_v47  ;;  %1267 = vmatpush2.msra.mxu1 %v768_v17 }
 0x187   : > { %1427 = vmatprep.subr.mxu0 %v2706_v0  ;;  %1268 = vmatprep.subr.mxu1 %v761_v31 }
 0x188   : > { %1270 = vmatprep.mubr.f32.mxu1 %v2386_v9  ;;  %1428 = vmatpush2.msra.mxu0 %v2710_v6 }
 0x189   : > { %1431 = vmatprep.mubr.f32.mxu0 %v2386_v9  ;;  %1269 = vmatpush2.msra.mxu1 %v760_v63  ;;  %v3140_v9 = vld [vmem:[#allocation13_spill] sm:$0xff] }
 0x18a   : > { %1429 = vmatprep.subr.mxu0 %v2714_v58  ;;  %1787 = vmatprep.subr.mxu1 %v2383_v5  ;;  %v3139_v5 = vld [vmem:[#allocation12_spill] sm:$0xff] }
 0x18b   : > { %1430 = vmatpush2.msra.mxu0 %v2718_v52  ;;  %1271 = vmatmul.mubr.f32.vlgmr.msra.gmra.mxu1 %v2388_v10 }
 0x18c   : > { %1819 = vmatpush1.msra.mxu1 %v2390_v13  ;;  %1432 = vmatmul.mubr.f32.vlgmr.msra.gmra.mxu0 %v2388_v10  ;;  %v3141_v10 = vld [vmem:[#allocation14_spill] sm:$0xff]  ;;  %v3142_v13 = vld [vmem:[#allocation16_spill] sm:$0xff] }
 0x18d   : > { %1276 = vmatprep.mubr.f32.mxu1 %v2398_v19  ;;  %1788 = vmatprep.subr.mxu1 %v2394_v15  ;;  %v3143_v15 = vld [vmem:[#allocation15_spill] sm:$0xff] }
 0x18e   : > { %1437 = vmatprep.mubr.f32.mxu0 %v2398_v19  ;;  %1820 = vmatpush1.msra.mxu1 %v2402_v22  ;;  %v3144_v19 = vld [vmem:[#allocation17_spill] sm:$0xff]  ;;  %v3145_v22 = vld [vmem:[#allocation18_spill] sm:$0xff] }
 0x18f   : > { %1789 = vmatprep.subr.mxu1 %v2408_v27  ;;  %1277 = vmatmul.mubr.f32.gmra.mxu1 %v2404_v23  ;;  %v3147_v27 = vld [vmem:[#allocation21_spill] sm:$0xff] }
 0x190   : > { %1821 = vmatpush1.msra.mxu1 %v2414_v30  ;;  %1438 = vmatmul.mubr.f32.gmra.mxu0 %v2404_v23  ;;  %v3146_v23 = vld [vmem:[#allocation19_spill] sm:$0xff] }
 0x191   : > { %1282 = vmatprep.mubr.f32.mxu1 %v2411_v29  ;;  %1790 = vmatprep.subr.mxu1 %v2417_v33  ;;  %v3149_v30 = vld [vmem:[#allocation23_spill] sm:$0xff]  ;;  %v3150_v33 = vld [vmem:[#allocation22_spill] sm:$0xff] }
 0x192   : > { %1443 = vmatprep.mubr.f32.mxu0 %v2411_v29  ;;  %1822 = vmatpush1.msra.mxu1 %v2421_v35  ;;  %v3148_v29 = vld [vmem:[#allocation20_spill] sm:$0xff] }
 0x193   : > { %1791 = vmatprep.subr.mxu1 %v2428_v39  ;;  %1283 = vmatmul.mubr.f32.gmra.mxu1 %v2423_v36  ;;  %v3151_v35 = vld [vmem:[#allocation24_spill] sm:$0xff]  ;;  %v3153_v39 = vld [vmem:[#allocation27_spill] sm:$0xff] }
 0x194   : > { %1823 = vmatpush1.msra.mxu1 %v2434_v43  ;;  %1444 = vmatmul.mubr.f32.gmra.mxu0 %v2423_v36  ;;  %v3152_v36 = vld [vmem:[#allocation25_spill] sm:$0xff]  ;;  %v3155_v43 = vld [vmem:[#allocation28_spill] sm:$0xff] }
 0x195   : > { %1288 = vmatprep.mubr.f32.mxu1 %v2431_v42  ;;  %1792 = vmatprep.subr.mxu1 %v2437_v45  ;;  %v3156_v45 = vld [vmem:[#allocation29_spill] sm:$0xff] }
 0x196   : > { %1449 = vmatprep.mubr.f32.mxu0 %v2431_v42  ;;  %1824 = vmatpush1.msra.mxu1 %v2441_v48  ;;  %v3154_v42 = vld [vmem:[#allocation26_spill] sm:$0xff] }
 0x197   : > { %1793 = vmatprep.subr.mxu1 %v2448_v53  ;;  %1289 = vmatmul.mubr.f32.gmra.mxu1 %v2443_v50  ;;  %v3157_v48 = vld [vmem:[#allocation30_spill] sm:$0xff]  ;;  %v3159_v53 = vld [vmem:[#allocation31_spill] sm:$0xff] }
 0x198   : > { %1825 = vmatpush1.msra.mxu1 %v2454_v57  ;;  %1450 = vmatmul.mubr.f32.gmra.mxu0 %v2443_v50  ;;  %v3158_v50 = vld [vmem:[#allocation32_spill] sm:$0xff]  ;;  %v3161_v57 = vld [vmem:[#allocation33_spill] sm:$0xff] }
 0x199   : > { %1294 = vmatprep.mubr.f32.mxu1 %v2451_v56  ;;  %1794 = vmatprep.subr.mxu1 %v2457_v59  ;;  %v3162_v59 = vld [vmem:[#allocation35_spill] sm:$0xff] }
 0x19a   : > { %1455 = vmatprep.mubr.f32.mxu0 %v2451_v56  ;;  %1826 = vmatpush1.msra.mxu1 %v2461_v62  ;;  %v3160_v56 = vld [vmem:[#allocation34_spill] sm:$0xff]  ;;  %v3163_v62 = vld [vmem:[#allocation36_spill] sm:$0xff] }
 0x19b   : > { %1795 = vmatprep.subr.mxu1 %v2468_v4  ;;  %1295 = vmatmul.mubr.f32.gmra.mxu1 %v2463_v1  ;;  %v3165_v4 = vld [vmem:[#allocation37_spill] sm:$0xff] }
 0x19c   : > { %1827 = vmatpush1.msra.mxu1 %v2476_v11  ;;  %1456 = vmatmul.mubr.f32.gmra.mxu0 %v2463_v1  ;;  %v3164_v1 = vld [vmem:[#allocation38_spill] sm:$0xff]  ;;  %v3167_v11 = vld [vmem:[#allocation40_spill] sm:$0xff] }
 0x19d   : > { %1300 = vmatprep.mubr.f32.mxu1 %v2473_v8  ;;  %1796 = vmatprep.subr.mxu1 %v2479_v14  ;;  %v3168_v14 = vld [vmem:[#allocation41_spill] sm:$0xff] }
 0x19e   : > { %1461 = vmatprep.mubr.f32.mxu0 %v2473_v8  ;;  %1828 = vmatpush1.msra.mxu1 %v2483_v18  ;;  %v3166_v8 = vld [vmem:[#allocation39_spill] sm:$0xff] }
 0x19f   : > { %1797 = vmatprep.subr.mxu1 %v2492_v26  ;;  %1301 = vmatmul.mubr.f32.gmra.mxu1 %v2487_v21  ;;  %v3169_v18 = vld [vmem:[#allocation43_spill] sm:$0xff]  ;;  %v3171_v26 = vld [vmem:[#allocation44_spill] sm:$0xff] }
 0x1a0   : > { %1829 = vmatpush1.msra.mxu1 %v2498_v34  ;;  %1462 = vmatmul.mubr.f32.gmra.mxu0 %v2487_v21  ;;  %v3170_v21 = vld [vmem:[#allocation42_spill] sm:$0xff] }
 0x1a1   : > { %1306 = vmatprep.mubr.f32.mxu1 %v2495_v32  ;;  %1798 = vmatprep.subr.mxu1 %v2501_v37  ;;  %v3173_v34 = vld [vmem:[#allocation46_spill] sm:$0xff]  ;;  %v3174_v37 = vld [vmem:[#allocation47_spill] sm:$0xff] }
 0x1a2   : > { %1467 = vmatprep.mubr.f32.mxu0 %v2495_v32  ;;  %1830 = vmatpush1.msra.mxu1 %v2507_v41  ;;  %v3172_v32 = vld [vmem:[#allocation45_spill] sm:$0xff] }
 0x1a3   : > { %1799 = vmatprep.subr.mxu1 %v2514_v51  ;;  %1307 = vmatmul.mubr.f32.gmra.mxu1 %v2509_v46 }
 0x1a4   : > { %1831 = vmatpush1.msra.mxu1 %v2520_v55  ;;  %1468 = vmatmul.mubr.f32.gmra.mxu0 %v2509_v46 }
 0x1a5   : > { %1312 = vmatprep.mubr.f32.mxu1 %v2517_v54  ;;  %1800 = vmatprep.subr.mxu1 %v2523_v60 }
 0x1a6   : > { %1473 = vmatprep.mubr.f32.mxu0 %v2517_v54  ;;  %1832 = vmatpush1.msra.mxu1 %v2529_v2 }
 0x1a7   : > { %1801 = vmatprep.subr.mxu1 %v2537_v16  ;;  %1313 = vmatmul.mubr.f32.gmra.mxu1 %v2532_v3 }
 0x1a8   : > { %1833 = vmatpush1.msra.mxu1 %v2543_v7  ;;  %1474 = vmatmul.mubr.f32.gmra.mxu0 %v2532_v3 }
 0x1a9   : > { %1318 = vmatprep.mubr.f32.mxu1 %v3139_v5  ;;  %1802 = vmatprep.subr.mxu1 %v3140_v9 }
 0x1aa   : > { %1479 = vmatprep.mubr.f32.mxu0 %v3139_v5  ;;  %1834 = vmatpush1.msra.mxu1 %v3141_v10 }
 0x1ab   : > { %1803 = vmatprep.subr.mxu1 %v3142_v13  ;;  %1319 = vmatmul.mubr.f32.gmra.mxu1 %v3143_v15 }
 0x1ac   : > { %1835 = vmatpush2.msra.mxu1 %v2566_v20  ;;  %1480 = vmatmul.mubr.f32.gmra.mxu0 %v3143_v15 }
 0x1ad   : > { %1324 = vmatprep.mubr.f32.mxu1 %v3144_v19  ;;  %1804 = vmatprep.subr.mxu1 %v3145_v22 }
 0x1ae   : > { %1485 = vmatprep.mubr.f32.mxu0 %v3144_v19  ;;  %1836 = vmatpush2.msra.mxu1 %v3146_v23 }
 0x1af   : > { %1805 = vmatprep.subr.mxu1 %v3147_v27  ;;  %1325 = vmatmul.mubr.f32.gmra.mxu1 %v3148_v29 }
 0x1b0   : > { %1837 = vmatpush2.msra.mxu1 %v3149_v30  ;;  %1486 = vmatmul.mubr.f32.gmra.mxu0 %v3148_v29 }
 0x1b1   : > { %1330 = vmatprep.mubr.f32.mxu1 %v3150_v33  ;;  %1806 = vmatprep.subr.mxu1 %v3151_v35 }
 0x1b2   : > { %1491 = vmatprep.mubr.f32.mxu0 %v3150_v33  ;;  %1838 = vmatpush2.msra.mxu1 %v3152_v36 }
 0x1b3   : > { %1807 = vmatprep.subr.mxu1 %v3153_v39  ;;  %1331 = vmatmul.mubr.f32.gmra.mxu1 %v3154_v42 }
 0x1b4   : > { %1839 = vmatpush2.msra.mxu1 %v2610_v61  ;;  %1492 = vmatmul.mubr.f32.gmra.mxu0 %v3154_v42 }
 0x1b5   : > { %1336 = vmatprep.mubr.f32.mxu1 %v3155_v43  ;;  %1808 = vmatprep.subr.mxu1 %v3156_v45 }
 0x1b6   : > { %1497 = vmatprep.mubr.f32.mxu0 %v3155_v43  ;;  %1840 = vmatpush2.msra.mxu1 %v3157_v48 }
 0x1b7   : > { %1809 = vmatprep.subr.mxu1 %v3158_v50  ;;  %1337 = vmatmul.mubr.f32.gmra.mxu1 %v3159_v53 }
 0x1b8   : > { %1841 = vmatpush2.msra.mxu1 %v3160_v56  ;;  %1498 = vmatmul.mubr.f32.gmra.mxu0 %v3159_v53 }
 0x1b9   : > { %1342 = vmatprep.mubr.f32.mxu1 %v3161_v57  ;;  %1810 = vmatprep.subr.mxu1 %v3162_v59 }
 0x1ba   : > { %1842 = vmatpush2.msra.mxu1 %v3163_v62 }
 0x1bb   : > { %1811 = vmatprep.subr.mxu1 %v3164_v1  ;;  %1343 = vmatmul.mubr.f32.gmra.mxu1 %v3165_v4 }
 0x1bc   : > { %1843 = vmatpush2.msra.mxu1 %v2652_v25  ;;  %1348 = vmatprep.mubr.f32.mxu1 %v3166_v8 }
 0x1bd   : > { %1812 = vmatprep.subr.mxu1 %v3167_v11 }
 0x1be   : > { %1844 = vmatpush2.msra.mxu1 %v3168_v14 }
 0x1bf   : > { %1813 = vmatprep.subr.mxu1 %v3169_v18  ;;  %1349 = vmatmul.mubr.f32.gmra.mxu1 %v3170_v21 }
 0x1c0   : > { %1845 = vmatpush2.msra.mxu1 %v2672_v44  ;;  %1354 = vmatprep.mubr.f32.mxu1 %v3171_v26 }
 0x1c1   : > { %1814 = vmatprep.subr.mxu1 %v3172_v32 }
 0x1c2   : > { %1846 = vmatpush2.msra.mxu1 %v3173_v34 }
 0x1c3   : > { %1815 = vmatprep.subr.mxu1 %v2686_v49  ;;  %1355 = vmatmul.mubr.f32.gmra.mxu1 %v3174_v37 }
 0x1c4   : > { %1847 = vmatpush2.msra.mxu1 %v2692_v24  ;;  %1360 = vmatprep.mubr.f32.mxu1 %v2689_v38 }
 0x1c5   : > { %1816 = vmatprep.subr.mxu1 %v2695_v28 }
 0x1c6   : > { %1848 = vmatpush2.msra.mxu1 %v2699_v12 }
 0x1c7   : > { %1817 = vmatprep.subr.mxu1 %v2706_v0  ;;  %1361 = vmatmul.mubr.f32.gmra.mxu1 %v2701_v47 }
 0x1c8   : > { %1849 = vmatpush2.msra.mxu1 %v2710_v6  ;;  %1503 = vmatprep.mubr.f32.mxu1 %v3161_v57 }
 0x1c9   : > { %1818 = vmatprep.subr.mxu1 %v2714_v58 }
 0x1ca   : > { %1850 = vmatpush2.msra.mxu1 %v2718_v52 }
 0x1cb   : > { %1504 = vmatmul.mubr.f32.vlgmr.msra.gmra.mxu1 %v3165_v4 }
 0x1cc   : > { %1509 = vmatprep.mubr.f32.mxu1 %v3166_v8 }
 0x1cf   : > { %1510 = vmatmul.mubr.f32.gmra.mxu1 %v3170_v21 }
 0x1d0   : > { %1515 = vmatprep.mubr.f32.mxu1 %v3171_v26 }
 0x1d3   : > { %1516 = vmatmul.mubr.f32.gmra.mxu1 %v3174_v37 }
 0x1d4   : > { %1521 = vmatprep.mubr.f32.mxu1 %v2689_v38 }
 0x1d7   : > { %1522 = vmatmul.mubr.f32.gmra.mxu1 %v2701_v47 }
 0x1ec   : > { %v950_v41 = vpop.f32.mrf.mxu1  ;;  %v1111_v46 = vpop.f32.mrf.mxu0 }
 0x1ed   : > { %1528 = vst [vmem:[%s2850_s27] sm:$0xff] %v950_v41  ;;  %1530 = vst [vmem:[%s2850_s27 + $0x10] sm:$0xff] %v1111_v46 }
 0x1ee   : > { %v952_v51 = vpop.f32.mrf.mxu1  ;;  %v1113_v54 = vpop.f32.mrf.mxu0 }
 0x1ef   : > { %1529 = vst [vmem:[%s2850_s27 + $0x8] sm:$0xff] %v952_v51  ;;  %1531 = vst [vmem:[%s2850_s27 + $0x18] sm:$0xff] %v1113_v54 }
 0x1f1   : > { %v956_v55 = vpop.f32.mrf.mxu1 }
 0x1f2   : > { %1536 = vst [vmem:[%s2850_s27 + $0x40] sm:$0xff] %v956_v55  ;;  %v1117_v60 = vpop.f32.mrf.mxu0 }
 0x1f3   : > { %1538 = vst [vmem:[%s2850_s27 + $0x50] sm:$0xff] %v1117_v60  ;;  %v958_v2 = vpop.f32.mrf.mxu1 }
 0x1f4   : > { %1537 = vst [vmem:[%s2850_s27 + $0x48] sm:$0xff] %v958_v2  ;;  %v1119_v3 = vpop.f32.mrf.mxu0 }
 0x1f5   : > { %1539 = vst [vmem:[%s2850_s27 + $0x58] sm:$0xff] %v1119_v3 }
 0x1f7   : > { %v962_v16 = vpop.f32.mrf.mxu1 }
 0x1f8   : > { %1544 = vst [vmem:[%s2850_s27 + $0x80] sm:$0xff] %v962_v16  ;;  %v1123_v7 = vpop.f32.mrf.mxu0 }
 0x1f9   : > { %1546 = vst [vmem:[%s2850_s27 + $0x90] sm:$0xff] %v1123_v7  ;;  %v964_v20 = vpop.f32.mrf.mxu1 }
 0x1fa   : > { %1545 = vst [vmem:[%s2850_s27 + $0x88] sm:$0xff] %v964_v20  ;;  %v1125_v28 = vpop.f32.mrf.mxu0 }
 0x1fb   : > { %1547 = vst [vmem:[%s2850_s27 + $0x98] sm:$0xff] %v1125_v28 }
 0x1fd   : > { %v968_v61 = vpop.f32.mrf.mxu1 }
 0x1fe   : > { %1552 = vst [vmem:[%s2850_s27 + $0xc0] sm:$0xff] %v968_v61  ;;  %v1129_v49 = vpop.f32.mrf.mxu0 }
 0x1ff   : > { %1554 = vst [vmem:[%s2850_s27 + $0xd0] sm:$0xff] %v1129_v49  ;;  %v970_v31 = vpop.f32.mrf.mxu1 }
 0x200   : > { %1553 = vst [vmem:[%s2850_s27 + $0xc8] sm:$0xff] %v970_v31  ;;  %v1131_v25 = vpop.f32.mrf.mxu0 }
 0x201   : > { %1555 = vst [vmem:[%s2850_s27 + $0xd8] sm:$0xff] %v1131_v25 }
 0x203   : > { %v974_v12 = vpop.f32.mrf.mxu1 }
 0x204   : > { %1560 = vst [vmem:[%s2850_s27 + $0x100] sm:$0xff] %v974_v12  ;;  %v1135_v17 = vpop.f32.mrf.mxu0 }
 0x205   : > { %1562 = vst [vmem:[%s2850_s27 + $0x110] sm:$0xff] %v1135_v17  ;;  %v976_v44 = vpop.f32.mrf.mxu1 }
 0x206   : > { %1561 = vst [vmem:[%s2850_s27 + $0x108] sm:$0xff] %v976_v44  ;;  %v1137_v38 = vpop.f32.mrf.mxu0 }
 0x207   : > { %1563 = vst [vmem:[%s2850_s27 + $0x118] sm:$0xff] %v1137_v38 }
 0x209   : > { %v980_v24 = vpop.f32.mrf.mxu1 }
 0x20a   : > { %1568 = vst [vmem:[%s2850_s27 + $0x140] sm:$0xff] %v980_v24  ;;  %v1141_v40 = vpop.f32.mrf.mxu0 }
 0x20b   : > { %1570 = vst [vmem:[%s2850_s27 + $0x150] sm:$0xff] %v1141_v40  ;;  %v982_v47 = vpop.f32.mrf.mxu1 }
 0x20c   : > { %1569 = vst [vmem:[%s2850_s27 + $0x148] sm:$0xff] %v982_v47  ;;  %v1143_v0 = vpop.f32.mrf.mxu0 }
 0x20d   : > { %1571 = vst [vmem:[%s2850_s27 + $0x158] sm:$0xff] %v1143_v0 }
 0x20f   : > { %v986_v6 = vpop.f32.mrf.mxu1 }
 0x210   : > { %1576 = vst [vmem:[%s2850_s27 + $0x180] sm:$0xff] %v986_v6  ;;  %v1147_v63 = vpop.f32.mrf.mxu0 }
 0x211   : > { %1578 = vst [vmem:[%s2850_s27 + $0x190] sm:$0xff] %v1147_v63  ;;  %v988_v58 = vpop.f32.mrf.mxu1 }
 0x212   : > { %1577 = vst [vmem:[%s2850_s27 + $0x188] sm:$0xff] %v988_v58  ;;  %v1149_v52 = vpop.f32.mrf.mxu0 }
 0x213   : > { %1579 = vst [vmem:[%s2850_s27 + $0x198] sm:$0xff] %v1149_v52 }
 0x215   : > { %v992_v5 = vpop.f32.mrf.mxu1 }
 0x216   : > { %1584 = vst [vmem:[%s2850_s27 + $0x1c0] sm:$0xff] %v992_v5  ;;  %v1153_v9 = vpop.f32.mrf.mxu0 }
 0x217   : > { %1586 = vst [vmem:[%s2850_s27 + $0x1d0] sm:$0xff] %v1153_v9  ;;  %v994_v10 = vpop.f32.mrf.mxu1 }
 0x218   : > { %1585 = vst [vmem:[%s2850_s27 + $0x1c8] sm:$0xff] %v994_v10  ;;  %v1155_v13 = vpop.f32.mrf.mxu0 }
 0x219   : > { %1587 = vst [vmem:[%s2850_s27 + $0x1d8] sm:$0xff] %v1155_v13 }
 0x21b   : > { %v998_v15 = vpop.f32.mrf.mxu1 }
 0x21c   : > { %1592 = vst [vmem:[%s2850_s27 + $0x200] sm:$0xff] %v998_v15  ;;  %v1159_v19 = vpop.f32.mrf.mxu0 }
 0x21d   : > { %1594 = vst [vmem:[%s2850_s27 + $0x210] sm:$0xff] %v1159_v19  ;;  %v1000_v22 = vpop.f32.mrf.mxu1 }
 0x21e   : > { %1593 = vst [vmem:[%s2850_s27 + $0x208] sm:$0xff] %v1000_v22  ;;  %v1161_v23 = vpop.f32.mrf.mxu0 }
 0x21f   : > { %1595 = vst [vmem:[%s2850_s27 + $0x218] sm:$0xff] %v1161_v23 }
 0x221   : > { %v1004_v27 = vpop.f32.mrf.mxu1 }
 0x222   : > { %1600 = vst [vmem:[%s2850_s27 + $0x240] sm:$0xff] %v1004_v27  ;;  %v1165_v29 = vpop.f32.mrf.mxu0 }
 0x223   : > { %1602 = vst [vmem:[%s2850_s27 + $0x250] sm:$0xff] %v1165_v29  ;;  %v1006_v30 = vpop.f32.mrf.mxu1 }
 0x224   : > { %1601 = vst [vmem:[%s2850_s27 + $0x248] sm:$0xff] %v1006_v30  ;;  %v1167_v33 = vpop.f32.mrf.mxu0 }
 0x225   : > { %1603 = vst [vmem:[%s2850_s27 + $0x258] sm:$0xff] %v1167_v33 }
 0x227   : > { %v1010_v35 = vpop.f32.mrf.mxu1 }
 0x228   : > { %1608 = vst [vmem:[%s2850_s27 + $0x280] sm:$0xff] %v1010_v35  ;;  %v1171_v36 = vpop.f32.mrf.mxu0 }
 0x229   : > { %1610 = vst [vmem:[%s2850_s27 + $0x290] sm:$0xff] %v1171_v36  ;;  %v1012_v39 = vpop.f32.mrf.mxu1 }
 0x22a   : > { %1609 = vst [vmem:[%s2850_s27 + $0x288] sm:$0xff] %v1012_v39  ;;  %v1173_v42 = vpop.f32.mrf.mxu0 }
 0x22b   : > { %1611 = vst [vmem:[%s2850_s27 + $0x298] sm:$0xff] %v1173_v42 }
 0x22d   : > { %v1016_v43 = vpop.f32.mrf.mxu1 }
 0x22e   : > { %1616 = vst [vmem:[%s2850_s27 + $0x2c0] sm:$0xff] %v1016_v43  ;;  %v1177_v45 = vpop.f32.mrf.mxu0 }
 0x22f   : > { %1618 = vst [vmem:[%s2850_s27 + $0x2d0] sm:$0xff] %v1177_v45  ;;  %v1018_v48 = vpop.f32.mrf.mxu1 }
 0x230   : > { %1617 = vst [vmem:[%s2850_s27 + $0x2c8] sm:$0xff] %v1018_v48  ;;  %v1179_v50 = vpop.f32.mrf.mxu0 }
 0x231   : > { %1619 = vst [vmem:[%s2850_s27 + $0x2d8] sm:$0xff] %v1179_v50 }
 0x233   : > { %v1022_v53 = vpop.f32.mrf.mxu1 }
 0x234   : > { %1624 = vst [vmem:[%s2850_s27 + $0x300] sm:$0xff] %v1022_v53  ;;  %v1183_v56 = vpop.f32.mrf.mxu0 }
 0x235   : > { %1626 = vst [vmem:[%s2850_s27 + $0x310] sm:$0xff] %v1183_v56  ;;  %v1024_v57 = vpop.f32.mrf.mxu1 }
 0x236   : > { %1625 = vst [vmem:[%s2850_s27 + $0x308] sm:$0xff] %v1024_v57  ;;  %v1185_v59 = vpop.f32.mrf.mxu0 }
 0x237   : > { %1627 = vst [vmem:[%s2850_s27 + $0x318] sm:$0xff] %v1185_v59 }
 0x239   : > { %v1028_v62 = vpop.f32.mrf.mxu1 }
 0x23a   : > { %1632 = vst [vmem:[%s2850_s27 + $0x340] sm:$0xff] %v1028_v62  ;;  %v1189_v1 = vpop.f32.mrf.mxu0 }
 0x23b   : > { %1634 = vst [vmem:[%s2850_s27 + $0x350] sm:$0xff] %v1189_v1  ;;  %v1030_v4 = vpop.f32.mrf.mxu1 }
 0x23c   : > { %1633 = vst [vmem:[%s2850_s27 + $0x348] sm:$0xff] %v1030_v4  ;;  %v1191_v8 = vpop.f32.mrf.mxu0 }
 0x23d   : > { %1635 = vst [vmem:[%s2850_s27 + $0x358] sm:$0xff] %v1191_v8 }
 0x23f   : > { %v1034_v11 = vpop.f32.mrf.mxu1 }
 0x240   : > { %1640 = vst [vmem:[%s2850_s27 + $0x380] sm:$0xff] %v1034_v11  ;;  %v1195_v14 = vpop.f32.mrf.mxu0 }
 0x241   : > { %1642 = vst [vmem:[%s2850_s27 + $0x390] sm:$0xff] %v1195_v14  ;;  %v1036_v18 = vpop.f32.mrf.mxu1 }
 0x242   : > { %1641 = vst [vmem:[%s2850_s27 + $0x388] sm:$0xff] %v1036_v18  ;;  %v1197_v21 = vpop.f32.mrf.mxu0 }
 0x243   : > { %1643 = vst [vmem:[%s2850_s27 + $0x398] sm:$0xff] %v1197_v21 }
 0x245   : > { %v1040_v26 = vpop.f32.mrf.mxu1 }
 0x246   : > { %1648 = vst [vmem:[%s2850_s27 + $0x3c0] sm:$0xff] %v1040_v26  ;;  %v1201_v32 = vpop.f32.mrf.mxu0 }
 0x247   : > { %1650 = vst [vmem:[%s2850_s27 + $0x3d0] sm:$0xff] %v1201_v32  ;;  %v1042_v34 = vpop.f32.mrf.mxu1 }
 0x248   : > { %1649 = vst [vmem:[%s2850_s27 + $0x3c8] sm:$0xff] %v1042_v34  ;;  %v1203_v37 = vpop.f32.mrf.mxu0 }
 0x249   : > { %1651 = vst [vmem:[%s2850_s27 + $0x3d8] sm:$0xff] %v1203_v37 }
 0x24b   : > { %v1272_v41 = vpop.f32.mrf.mxu1 }
 0x24c   : > { %1532 = vst [vmem:[%s2850_s27 + $0x20] sm:$0xff] %v1272_v41  ;;  %v1433_v46 = vpop.f32.mrf.mxu0 }
 0x24d   : > { %1534 = vst [vmem:[%s2850_s27 + $0x30] sm:$0xff] %v1433_v46  ;;  %v1274_v51 = vpop.f32.mrf.mxu1 }
 0x24e   : > { %1533 = vst [vmem:[%s2850_s27 + $0x28] sm:$0xff] %v1274_v51  ;;  %v1435_v54 = vpop.f32.mrf.mxu0 }
 0x24f   : > { %1535 = vst [vmem:[%s2850_s27 + $0x38] sm:$0xff] %v1435_v54  ;;  %v1278_v55 = vpop.f32.mrf.mxu1 }
 0x250   : > { %1540 = vst [vmem:[%s2850_s27 + $0x60] sm:$0xff] %v1278_v55  ;;  %v1439_v60 = vpop.f32.mrf.mxu0 }
 0x251   : > { %1542 = vst [vmem:[%s2850_s27 + $0x70] sm:$0xff] %v1439_v60  ;;  %v1280_v2 = vpop.f32.mrf.mxu1 }
 0x252   : > { %1541 = vst [vmem:[%s2850_s27 + $0x68] sm:$0xff] %v1280_v2  ;;  %v1441_v3 = vpop.f32.mrf.mxu0 }
 0x253   : > { %1543 = vst [vmem:[%s2850_s27 + $0x78] sm:$0xff] %v1441_v3  ;;  %v1284_v16 = vpop.f32.mrf.mxu1 }
 0x254   : > { %1548 = vst [vmem:[%s2850_s27 + $0xa0] sm:$0xff] %v1284_v16  ;;  %v1445_v7 = vpop.f32.mrf.mxu0 }
 0x255   : > { %1550 = vst [vmem:[%s2850_s27 + $0xb0] sm:$0xff] %v1445_v7  ;;  %v1286_v20 = vpop.f32.mrf.mxu1 }
 0x256   : > { %1549 = vst [vmem:[%s2850_s27 + $0xa8] sm:$0xff] %v1286_v20  ;;  %v1447_v28 = vpop.f32.mrf.mxu0 }
 0x257   : > { %1551 = vst [vmem:[%s2850_s27 + $0xb8] sm:$0xff] %v1447_v28  ;;  %v1290_v61 = vpop.f32.mrf.mxu1 }
 0x258   : > { %1556 = vst [vmem:[%s2850_s27 + $0xe0] sm:$0xff] %v1290_v61  ;;  %v1451_v49 = vpop.f32.mrf.mxu0 }
 0x259   : > { %1558 = vst [vmem:[%s2850_s27 + $0xf0] sm:$0xff] %v1451_v49  ;;  %v1292_v31 = vpop.f32.mrf.mxu1 }
 0x25a   : > { %1557 = vst [vmem:[%s2850_s27 + $0xe8] sm:$0xff] %v1292_v31  ;;  %v1453_v25 = vpop.f32.mrf.mxu0 }
 0x25b   : > { %1559 = vst [vmem:[%s2850_s27 + $0xf8] sm:$0xff] %v1453_v25  ;;  %v1296_v12 = vpop.f32.mrf.mxu1 }
 0x25c   : > { %1564 = vst [vmem:[%s2850_s27 + $0x120] sm:$0xff] %v1296_v12  ;;  %v1457_v17 = vpop.f32.mrf.mxu0 }
 0x25d   : > { %1566 = vst [vmem:[%s2850_s27 + $0x130] sm:$0xff] %v1457_v17  ;;  %v1298_v44 = vpop.f32.mrf.mxu1 }
 0x25e   : > { %1565 = vst [vmem:[%s2850_s27 + $0x128] sm:$0xff] %v1298_v44  ;;  %v1459_v38 = vpop.f32.mrf.mxu0 }
 0x25f   : > { %1567 = vst [vmem:[%s2850_s27 + $0x138] sm:$0xff] %v1459_v38  ;;  %v1302_v24 = vpop.f32.mrf.mxu1 }
 0x260   : > { %1572 = vst [vmem:[%s2850_s27 + $0x160] sm:$0xff] %v1302_v24  ;;  %v1463_v40 = vpop.f32.mrf.mxu0 }
 0x261   : > { %1574 = vst [vmem:[%s2850_s27 + $0x170] sm:$0xff] %v1463_v40  ;;  %v1304_v47 = vpop.f32.mrf.mxu1 }
 0x262   : > { %1573 = vst [vmem:[%s2850_s27 + $0x168] sm:$0xff] %v1304_v47  ;;  %v1465_v0 = vpop.f32.mrf.mxu0 }
 0x263   : > { %1575 = vst [vmem:[%s2850_s27 + $0x178] sm:$0xff] %v1465_v0  ;;  %v1308_v6 = vpop.f32.mrf.mxu1 }
 0x264   : > { %1580 = vst [vmem:[%s2850_s27 + $0x1a0] sm:$0xff] %v1308_v6  ;;  %v1469_v63 = vpop.f32.mrf.mxu0 }
 0x265   : > { %1582 = vst [vmem:[%s2850_s27 + $0x1b0] sm:$0xff] %v1469_v63  ;;  %v1310_v58 = vpop.f32.mrf.mxu1 }
 0x266   : > { %1581 = vst [vmem:[%s2850_s27 + $0x1a8] sm:$0xff] %v1310_v58  ;;  %v1471_v52 = vpop.f32.mrf.mxu0 }
 0x267   : > { %1583 = vst [vmem:[%s2850_s27 + $0x1b8] sm:$0xff] %v1471_v52  ;;  %v1314_v5 = vpop.f32.mrf.mxu1 }
 0x268   : > { %1588 = vst [vmem:[%s2850_s27 + $0x1e0] sm:$0xff] %v1314_v5  ;;  %v1475_v9 = vpop.f32.mrf.mxu0 }
 0x269   : > { %1590 = vst [vmem:[%s2850_s27 + $0x1f0] sm:$0xff] %v1475_v9  ;;  %v1316_v10 = vpop.f32.mrf.mxu1 }
 0x26a   : > { %1589 = vst [vmem:[%s2850_s27 + $0x1e8] sm:$0xff] %v1316_v10  ;;  %v1477_v13 = vpop.f32.mrf.mxu0 }
 0x26b   : > { %1591 = vst [vmem:[%s2850_s27 + $0x1f8] sm:$0xff] %v1477_v13  ;;  %v1320_v15 = vpop.f32.mrf.mxu1 }
 0x26c   : > { %1596 = vst [vmem:[%s2850_s27 + $0x220] sm:$0xff] %v1320_v15  ;;  %v1481_v19 = vpop.f32.mrf.mxu0 }
 0x26d   : > { %1598 = vst [vmem:[%s2850_s27 + $0x230] sm:$0xff] %v1481_v19  ;;  %v1322_v22 = vpop.f32.mrf.mxu1 }
 0x26e   : > { %1597 = vst [vmem:[%s2850_s27 + $0x228] sm:$0xff] %v1322_v22  ;;  %v1483_v23 = vpop.f32.mrf.mxu0 }
 0x26f   : > { %1599 = vst [vmem:[%s2850_s27 + $0x238] sm:$0xff] %v1483_v23  ;;  %v1326_v27 = vpop.f32.mrf.mxu1 }
 0x270   : > { %1604 = vst [vmem:[%s2850_s27 + $0x260] sm:$0xff] %v1326_v27  ;;  %v1487_v29 = vpop.f32.mrf.mxu0 }
 0x271   : > { %1606 = vst [vmem:[%s2850_s27 + $0x270] sm:$0xff] %v1487_v29  ;;  %v1328_v30 = vpop.f32.mrf.mxu1 }
 0x272   : > { %1605 = vst [vmem:[%s2850_s27 + $0x268] sm:$0xff] %v1328_v30  ;;  %v1489_v33 = vpop.f32.mrf.mxu0 }
 0x273   : > { %1607 = vst [vmem:[%s2850_s27 + $0x278] sm:$0xff] %v1489_v33  ;;  %v1332_v35 = vpop.f32.mrf.mxu1 }
 0x274   : > { %1612 = vst [vmem:[%s2850_s27 + $0x2a0] sm:$0xff] %v1332_v35  ;;  %v1493_v36 = vpop.f32.mrf.mxu0 }
 0x275   : > { %1614 = vst [vmem:[%s2850_s27 + $0x2b0] sm:$0xff] %v1493_v36  ;;  %v1334_v39 = vpop.f32.mrf.mxu1 }
 0x276   : > { %1613 = vst [vmem:[%s2850_s27 + $0x2a8] sm:$0xff] %v1334_v39  ;;  %v1495_v42 = vpop.f32.mrf.mxu0 }
 0x277   : > { %1615 = vst [vmem:[%s2850_s27 + $0x2b8] sm:$0xff] %v1495_v42  ;;  %v1338_v43 = vpop.f32.mrf.mxu1 }
 0x278   : > { %1620 = vst [vmem:[%s2850_s27 + $0x2e0] sm:$0xff] %v1338_v43  ;;  %v1499_v45 = vpop.f32.mrf.mxu0 }
 0x279   : > { %1622 = vst [vmem:[%s2850_s27 + $0x2f0] sm:$0xff] %v1499_v45  ;;  %v1340_v48 = vpop.f32.mrf.mxu1 }
 0x27a   : > { %1621 = vst [vmem:[%s2850_s27 + $0x2e8] sm:$0xff] %v1340_v48  ;;  %v1501_v50 = vpop.f32.mrf.mxu0 }
 0x27b   : > { %1623 = vst [vmem:[%s2850_s27 + $0x2f8] sm:$0xff] %v1501_v50  ;;  %v1344_v53 = vpop.f32.mrf.mxu1 }
 0x27c   : > { %1628 = vst [vmem:[%s2850_s27 + $0x320] sm:$0xff] %v1344_v53 }
 0x27d   : > { %v1346_v56 = vpop.f32.mrf.mxu1 }
 0x27e   : > { %1629 = vst [vmem:[%s2850_s27 + $0x328] sm:$0xff] %v1346_v56 }
 0x27f   : > { %v1350_v57 = vpop.f32.mrf.mxu1 }
 0x280   : > { %1636 = vst [vmem:[%s2850_s27 + $0x360] sm:$0xff] %v1350_v57 }
 0x281   : > { %v1352_v59 = vpop.f32.mrf.mxu1 }
 0x282   : > { %1637 = vst [vmem:[%s2850_s27 + $0x368] sm:$0xff] %v1352_v59 }
 0x283   : > { %v1356_v62 = vpop.f32.mrf.mxu1 }
 0x284   : > { %1644 = vst [vmem:[%s2850_s27 + $0x3a0] sm:$0xff] %v1356_v62 }
 0x285   : > { %v1358_v1 = vpop.f32.mrf.mxu1 }
 0x286   : > { %1645 = vst [vmem:[%s2850_s27 + $0x3a8] sm:$0xff] %v1358_v1 }
 0x287   : > { %v1362_v4 = vpop.f32.mrf.mxu1 }
 0x288   : > { %1652 = vst [vmem:[%s2850_s27 + $0x3e0] sm:$0xff] %v1362_v4 }
 0x289   : > { %v1364_v8 = vpop.f32.mrf.mxu1 }
 0x28a   : > { %1653 = vst [vmem:[%s2850_s27 + $0x3e8] sm:$0xff] %v1364_v8 }
 0x28b   : > { %v1505_v11 = vpop.f32.mrf.mxu1 }
 0x28c   : > { %1630 = vst [vmem:[%s2850_s27 + $0x330] sm:$0xff] %v1505_v11 }
 0x28d   : > { %v1507_v14 = vpop.f32.mrf.mxu1 }
 0x28e   : > { %1631 = vst [vmem:[%s2850_s27 + $0x338] sm:$0xff] %v1507_v14 }
 0x28f   : > { %v1511_v18 = vpop.f32.mrf.mxu1 }
 0x290   : > { %1638 = vst [vmem:[%s2850_s27 + $0x370] sm:$0xff] %v1511_v18 }
 0x291   : > { %v1513_v21 = vpop.f32.mrf.mxu1 }
 0x292   : > { %1639 = vst [vmem:[%s2850_s27 + $0x378] sm:$0xff] %v1513_v21 }
 0x293   : > { %v1517_v26 = vpop.f32.mrf.mxu1 }
 0x294   : > { %1646 = vst [vmem:[%s2850_s27 + $0x3b0] sm:$0xff] %v1517_v26 }
 0x295   : > { %v1519_v32 = vpop.f32.mrf.mxu1 }
 0x296   : > { %1647 = vst [vmem:[%s2850_s27 + $0x3b8] sm:$0xff] %v1519_v32 }
 0x297   : > { %v1523_v34 = vpop.f32.mrf.mxu1 }
 0x298   : > { %1654 = vst [vmem:[%s2850_s27 + $0x3f0] sm:$0xff] %v1523_v34 }
 0x299   : > { %v1525_v37 = vpop.f32.mrf.mxu1 }
 0x29a   : > { %1655 = vst [vmem:[%s2850_s27 + $0x3f8] sm:$0xff] %v1525_v37 }
 0x29b   : > { %2001 = shalt.err (!%p1998_p5)
}
 0x29c   : > { %s2002_s12 = scalar_lea.hbm %s2983_s10, 16384  ;;  %s2006_s2 = scalar_lea.hbm %s3039_s4, 32768 }
 0x29d   : > { %p2003_p7 = scmp.ne.s32.totalorder %s2983_s10, %s2002_s12  ;;  %p2007_p9 = scmp.lt.s32.totalorder %s2983_s10, %s3039_s4 }
 0x29e   : > { %p2008_p11 = scmp.lt.s32.totalorder %s2006_s2, %s2002_s12 }
 0x29f   : > { %p2004_p6 = pnand %p2003_p7, %p2197_p13 }
 0x2a0   : > { %p2009_p12 = por %p2008_p11, %p2007_p9 }
 0x2a1   : > { %p2005_p4 = pneg %p2004_p6 }
 0x2a3   : > { %p2010_p1 = pnand %p2009_p12, %p2005_p4 }
 0x2a5   : > { %2013 = shalt.err (!%p2010_p1)
}
 0x2a6   : > { %s2083_s27 = smov 1024   ;;  %s2084_s7 = smov 64  }
 0x2a7   : > { %1857 = dma.vmem_to_hbm [thread:$0]  (%p2197_p13), %s2985_s8, 16384, %s2983_s10, %s1657_s14, %s2083_s27, %s2083_s27, %s2084_s7  }
 0x2a8 PF: > { %s1687_s9 = sand.u32 1, %s2052_s15   ;;  %p3175_p8 = scmp.ne.s32.totalorder %s3095_s26, 0 }
 0x2a9   : > { %p3176_p10 = scmp.ge.s32.totalorder %s2072_s20, 2  ;;  %s1688_s24 = scalar_lea.sflag [#allocation5], %s1687_s9 }
 0x2ab   : > { %p1868_p0 = pnand %p3176_p10, %p3175_p8 }
 0x2ad   : > { %p1869_p2 = pneg %p1868_p0 }
 0x2af   : > { %2047 = dma.done.wait (%p1869_p2), %s1688_s24, 16384  }
 0x2b0   : > { %2049 = vsyncadd (%p1869_p2), %s1688_s24, 4294950912  ;;  %s21_s20 = sadd.s32 1, %s2072_s20   ;;  %s3177_s15 = smov %s2056_s16 }
 0x2b1   : > { %p18_p3 = scmp.ge.s32.totalorder %s21_s20, 4   ;;  %s3178_s16 = smov %s2060_s17 }
 0x2b2   : > { %s3179_s17 = smov %s2206_s28  ;;  %s3180_s18 = smov %s2068_s19 }
 0x2b3   : > { %s3181_s19 = smov %s3183_s5  ;;  %20 = sbr.rel (!%p18_p3) target bundleno = 9 (0x9), region = 90 }
 0x2b8   :  { %1693 = vsyncpa [#allocation4], 1 }
 0x2b9   :  { %1695 = vsyncpa [#allocation4 + $0x1], 1 }
 0x2ba   :  { %1696 = vsyncpa [#allocation7], 1 }
 0x2bb   :  { %1697 = vsyncpa [#allocation5], 1 }
 0x2bc   :  { %1699 = vsyncpa [#allocation5 + $0x1], 1 }

</bundles_post_ra>
